<compile_context>
chip_gen: v5e
topology: v5e:2x2
jax: 0.10.0
libtpu: 0.0.40
codegen_flags: <defaults>
</compile_context>

<pallas_src>
import jax
import jax.numpy as jnp
from jax import lax
from jax.experimental import pallas as pl
from jax.experimental.pallas import tpu as pltpu


# ---------------------------------------------------------------------------
# Fused kernel: all LSTM layers + linear_hidden + linear_tweet_layer + sigmoid
# ---------------------------------------------------------------------------

def _make_fused_kernel(T, Bblk, H, n_layers):
    """Build the fused kernel for static T, Bblk (batch rows per grid step), H, L."""

    def kernel(*refs):
        # refs: x, (wih, whh, b) * L, h0, c0, w_hid, w_tweet(SMEM), bias(SMEM), y_out
        x_ref = refs[0]
        layer_refs = [(refs[1 + 3 * l], refs[2 + 3 * l], refs[3 + 3 * l])
                      for l in range(n_layers)]
        base = 1 + 3 * n_layers
        h0_ref, c0_ref, whid_ref, wtweet_ref, bias_ref = refs[base:base + 5]
        y_ref = refs[base + 5]

        # Lane mask selecting the "g" gate block (cols [2H,3H)) -> tanh, rest -> sigmoid.
        lane = lax.broadcasted_iota(jnp.int32, (Bblk, 4 * H), 1)
        g_is_tanh = (lane >= 2 * H) & (lane < 3 * H)

        whid = whid_ref[...]                       # (1, H) hoisted
        last = n_layers - 1

        seq = x_ref[...]                           # (T*Bblk, D_in) flat, time-major
        logits = jnp.zeros((Bblk, 1), jnp.float32)

        for l, (wih_ref, whh_ref, b_ref) in enumerate(layer_refs):
            wih = wih_ref[...]                     # (D_in_l, 4H)  hoisted loads
            whh = whh_ref[...]                     # (H, 4H)
            b = b_ref[...]                         # (1, 4H)

            # Batched input projection for ALL timesteps at once (MXU M = T*Bblk).
            gin = jnp.dot(seq, wih, preferred_element_type=jnp.float32) + b  # (T*Bblk,4H)

            h = h0_ref[l]                          # (Bblk, H)
            c = c0_ref[l]                          # (Bblk, H)
            outs = []
            for t in range(T):                     # static unroll (T small)
                g = gin[t * Bblk:(t + 1) * Bblk, :] + jnp.dot(
                    h, whh, preferred_element_type=jnp.float32)              # (Bblk,4H)
                # ONE full-vreg tanh per step:  sigmoid(x) = 0.5*(1 + tanh(x/2)).
                z = jnp.where(g_is_tanh, g, 0.5 * g)
                th = jnp.tanh(z)
                act = jnp.where(g_is_tanh, th, 0.5 * th + 0.5)
                i_g = act[:, 0 * H:1 * H]
                f_g = act[:, 1 * H:2 * H]
                g_g = act[:, 2 * H:3 * H]
                o_g = act[:, 3 * H:4 * H]
                c = f_g * c + i_g * g_g
                h = o_g * jnp.tanh(c)
                if l == last:
                    # Head fused into the recurrence: linear_hidden per step, weighted by
                    # w_tweet[t]; all per-step biases folded into one constant (bias_ref).
                    tweet_t = jnp.sum(h * whid, axis=-1, keepdims=True)      # (Bblk,1)
                    logits = logits + wtweet_ref[0, t] * tweet_t
                else:
                    outs.append(h)                 # stays in vregs; no VMEM round-trip
            if l != last:
                # Next layer's input built from vregs (sublane-aligned (Bblk,H) blocks):
                # replaces the former seq_ref store/reload barrier.
                seq = jnp.concatenate(outs, axis=0)                          # (T*Bblk,H)

        logits = logits + bias_ref[0, 0]           # = b_hid*sum(w_tweet) + b_tweet
        y_ref[...] = jax.nn.sigmoid(logits)        # (Bblk, 1)

    return kernel


# ---------------------------------------------------------------------------
# Wrapper
# ---------------------------------------------------------------------------

def depression_detector_forward(data, params, h0, c0):
    """data: (B, T, D) batch_first (same convention as the PyTorch module)."""
    B, T, D = data.shape
    H = h0.shape[-1]
    L = len(params["lstm"])
    Bblk = 8                                       # sublane width; batch rows per grid step
    Bp = ((B + Bblk - 1) // Bblk) * Bblk
    nB = Bp // Bblk

    # Time-major, batch padded to a multiple of the sublane width, then laid out as one
    # flat (T*Bblk, D) slab per batch block so the kernel needs no reshapes.
    x = jnp.transpose(data, (1, 0, 2))                               # (T, B, D)
    x = jnp.pad(x, ((0, 0), (0, Bp - B), (0, 0)))                    # (T, Bp, D)
    x = x.reshape(T, nB, Bblk, D).transpose(1, 0, 2, 3).reshape(nB, T * Bblk, D)

    h0p = jnp.pad(h0, ((0, 0), (0, Bp - B), (0, 0)))                 # (L, Bp, H)
    c0p = jnp.pad(c0, ((0, 0), (0, Bp - B), (0, 0)))
    h0p = h0p.reshape(L, nB, Bblk, H).transpose(1, 0, 2, 3)          # (nB, L, Bblk, H)
    c0p = c0p.reshape(L, nB, Bblk, H).transpose(1, 0, 2, 3)

    # Fold the per-timestep hidden bias and the tweet bias into one scalar constant.
    bias_const = (params["b_hid"][0] * jnp.sum(params["w_tweet"])
                  + params["b_tweet"][0]).reshape(1, 1)

    vmem_full = pl.BlockSpec(memory_space=pltpu.MemorySpace.VMEM)
    smem_full = pl.BlockSpec(memory_space=pltpu.MemorySpace.SMEM)

    args = [x]
    in_specs = [pl.BlockSpec((None, T * Bblk, D), lambda bb: (bb, 0, 0))]
    for (wih_t, whh_t, b) in params["lstm"]:
        args += [wih_t, whh_t, b]
        in_specs += [vmem_full, vmem_full, vmem_full]
    args += [h0p, c0p,
             params["w_hid"].reshape(1, H),
             params["w_tweet"].reshape(1, T),
             bias_const]
    in_specs += [pl.BlockSpec((None, L, Bblk, H), lambda bb: (bb, 0, 0, 0)),
                 pl.BlockSpec((None, L, Bblk, H), lambda bb: (bb, 0, 0, 0)),
                 vmem_full, smem_full, smem_full]

    y = pl.pallas_call(
        _make_fused_kernel(T, Bblk, H, L),
        grid=(nB,),
        out_shape=jax.ShapeDtypeStruct((nB, Bblk, 1), jnp.float32),
        in_specs=in_specs,
        out_specs=pl.BlockSpec((None, Bblk, 1), lambda bb: (bb, 0, 0)),
        compiler_params=pltpu.CompilerParams(
            dimension_semantics=("parallel",)),     # shards batch blocks across TCs on v7x
    )(*args)
    return y.reshape(Bp, 1)[:B, 0]


# ---------------------------------------------------------------------------
# Deterministic parameter init (PyTorch-style uniform(-1/sqrt(H), 1/sqrt(H)))
# ---------------------------------------------------------------------------

def init_params(key, input_size, seq_len, hidden, n_layers):
    bound = 1.0 / jnp.sqrt(hidden)
    params = {"lstm": []}
    for l in range(n_layers):
        d_in = input_size if l == 0 else hidden
        key, k1, k2, k3, k4 = jax.random.split(key, 5)
        w_ih = jax.random.uniform(k1, (4 * hidden, d_in), jnp.float32, -bound, bound)
        w_hh = jax.random.uniform(k2, (4 * hidden, hidden), jnp.float32, -bound, bound)
        b_ih = jax.random.uniform(k3, (4 * hidden,), jnp.float32, -bound, bound)
        b_hh = jax.random.uniform(k4, (4 * hidden,), jnp.float32, -bound, bound)
        params["lstm"].append((w_ih.T, w_hh.T, (b_ih + b_hh).reshape(1, 4 * hidden)))
    key, k1, k2, k3, k4 = jax.random.split(key, 5)
    params["w_hid"] = jax.random.uniform(k1, (hidden,), jnp.float32, -bound, bound)
    params["b_hid"] = jax.random.uniform(k2, (1,), jnp.float32, -bound, bound)
    tbound = 1.0 / jnp.sqrt(seq_len)
    params["w_tweet"] = jax.random.uniform(k3, (seq_len,), jnp.float32, -tbound, tbound)
    params["b_tweet"] = jax.random.uniform(k4, (1,), jnp.float32, -tbound, tbound)
    return params


# ---------------------------------------------------------------------------
# Pure-JAX reference (same math, no Pallas) for a correctness check
# ---------------------------------------------------------------------------

def reference_forward(data, params, h0, c0):
    x = jnp.transpose(data, (1, 0, 2))  # (T, B, D)
    for l, (wih_t, whh_t, b) in enumerate(params["lstm"]):
        H = h0.shape[-1]

        def step(carry, x_t):
            h, c = carry
            g = x_t @ wih_t + h @ whh_t + b[0]
            i = jax.nn.sigmoid(g[:, :H])
            f = jax.nn.sigmoid(g[:, H:2 * H])
            gg = jnp.tanh(g[:, 2 * H:3 * H])
            o = jax.nn.sigmoid(g[:, 3 * H:])
            c = f * c + i * gg
            h = o * jnp.tanh(c)
            return (h, c), h

        (_, _), x = lax.scan(step, (h0[l], c0[l]), x)
    tweet = jnp.einsum('tbh,h->tb', x, params["w_hid"]) + params["b_hid"][0]
    logits = jnp.einsum('tb,t->b', tweet, params["w_tweet"]) + params["b_tweet"][0]
    return jax.nn.sigmoid(logits)


# ---------------------------------------------------------------------------

if __name__ == "__main__":
    B, T, D, H, L = 2, 8, 16, 32, 2   # batch, seq_len, input_size, hidden_dim, num_layers

    key = jax.random.PRNGKey(0)
    k_data, k_h, k_c, k_p = jax.random.split(key, 4)

    data = jax.random.normal(k_data, (B, T, D), jnp.float32)
    # get_hidden_state(): randn initial (h0, c0) of shape (num_layers, batch, hidden)
    h0 = jax.random.normal(k_h, (L, B, H), jnp.float32)
    c0 = jax.random.normal(k_c, (L, B, H), jnp.float32)
    params = init_params(k_p, D, T, H, L)

    y = depression_detector_forward(data, params, h0, c0)
    y = jax.block_until_ready(y)

    y_ref = reference_forward(data, params, h0, c0)
    assert y.shape == (B,)
    assert jnp.allclose(y, y_ref, rtol=1e-4, atol=1e-5), (y, y_ref)

    print("KERNEL_OK")
</pallas_src>

<mosaic_0001>
module attributes {stable_mosaic.version = 11 : i64} {
  func.func @kernel(%arg0: i32, %arg1: memref<1x64x16xf32, #tpu.memory_space<vmem>>, %arg2: memref<16x128xf32, #tpu.memory_space<vmem>>, %arg3: memref<32x128xf32, #tpu.memory_space<vmem>>, %arg4: memref<1x128xf32, #tpu.memory_space<vmem>>, %arg5: memref<32x128xf32, #tpu.memory_space<vmem>>, %arg6: memref<32x128xf32, #tpu.memory_space<vmem>>, %arg7: memref<1x128xf32, #tpu.memory_space<vmem>>, %arg8: memref<1x2x8x32xf32, #tpu.memory_space<vmem>>, %arg9: memref<1x2x8x32xf32, #tpu.memory_space<vmem>>, %arg10: memref<1x32xf32, #tpu.memory_space<vmem>>, %arg11: memref<1x8xf32, #tpu.memory_space<smem>>, %arg12: memref<1x1xf32, #tpu.memory_space<smem>>, %arg13: memref<1x8x1xf32, #tpu.memory_space<vmem>>) attributes {dimension_semantics = [#tpu.dimension_semantics<parallel>], iteration_bounds = array<i64: 1>, scalar_prefetch = 0 : i64, scratch_operands = 0 : i64, tpu.core_type = #tpu.core_type<tc>, window_params = [{transform_indices = @transform_0, window_bounds = array<i64: 1, 64, 16>}, {pipeline_mode = #tpu.pipeline_mode<synchronous>, transform_indices = @transform_1, window_bounds = array<i64: 16, 128>}, {pipeline_mode = #tpu.pipeline_mode<synchronous>, transform_indices = @transform_2, window_bounds = array<i64: 32, 128>}, {pipeline_mode = #tpu.pipeline_mode<synchronous>, transform_indices = @transform_3, window_bounds = array<i64: 1, 128>}, {pipeline_mode = #tpu.pipeline_mode<synchronous>, transform_indices = @transform_4, window_bounds = array<i64: 32, 128>}, {pipeline_mode = #tpu.pipeline_mode<synchronous>, transform_indices = @transform_5, window_bounds = array<i64: 32, 128>}, {pipeline_mode = #tpu.pipeline_mode<synchronous>, transform_indices = @transform_6, window_bounds = array<i64: 1, 128>}, {transform_indices = @transform_7, window_bounds = array<i64: 1, 2, 8, 32>}, {transform_indices = @transform_8, window_bounds = array<i64: 1, 2, 8, 32>}, {pipeline_mode = #tpu.pipeline_mode<synchronous>, transform_indices = @transform_9, window_bounds = array<i64: 1, 32>}, {transform_indices = @transform_10, window_bounds = array<i64: 1, 8>}, {transform_indices = @transform_11, window_bounds = array<i64: 1, 1>}, {transform_indices = @transform_12, window_bounds = array<i64: 1, 8, 1>}]} {
    %0 = tpu.iota {dimensions = array<i32: 1>} : vector<8x128xi32>
    %c64_i32 = arith.constant 64 : i32
    %1 = vector.broadcast %c64_i32 : i32 to vector<8x128xi32>
    %2 = arith.cmpi sge, %0, %1 : vector<8x128xi32>
    %c96_i32 = arith.constant 96 : i32
    %3 = vector.broadcast %c96_i32 : i32 to vector<8x128xi32>
    %4 = arith.cmpi slt, %0, %3 : vector<8x128xi32>
    %5 = arith.andi %2, %4 : vector<8x128xi1>
    %c0 = arith.constant 0 : index
    %c0_0 = arith.constant 0 : index
    %6 = vector.load %arg10[%c0, %c0_0] : memref<1x32xf32, #tpu.memory_space<vmem>>, vector<1x32xf32>
    %c0_1 = arith.constant 0 : index
    %c0_2 = arith.constant 0 : index
    %c0_3 = arith.constant 0 : index
    %7 = vector.load %arg1[%c0_1, %c0_2, %c0_3] : memref<1x64x16xf32, #tpu.memory_space<vmem>>, vector<1x64x16xf32>
    %8 = vector.shape_cast %7 : vector<1x64x16xf32> to vector<64x16xf32>
    %cst = arith.constant 0.000000e+00 : f32
    %9 = vector.broadcast %cst : f32 to vector<8x1xf32>
    %c0_4 = arith.constant 0 : index
    %c0_5 = arith.constant 0 : index
    %10 = vector.load %arg2[%c0_4, %c0_5] : memref<16x128xf32, #tpu.memory_space<vmem>>, vector<16x128xf32>
    %c0_6 = arith.constant 0 : index
    %c0_7 = arith.constant 0 : index
    %11 = vector.load %arg3[%c0_6, %c0_7] : memref<32x128xf32, #tpu.memory_space<vmem>>, vector<32x128xf32>
    %c0_8 = arith.constant 0 : index
    %c0_9 = arith.constant 0 : index
    %12 = vector.load %arg4[%c0_8, %c0_9] : memref<1x128xf32, #tpu.memory_space<vmem>>, vector<1x128xf32>
    %cst_10 = arith.constant dense<0.000000e+00> : vector<64x128xf32>
    %13 = tpu.matmul %8, %10, %cst_10 {dimension_numbers = #tpu.dot_dimension_numbers<[1], [0], [0], [1], [0, 0, 1, 1], [], []>} : vector<64x16xf32>, vector<16x128xf32>, vector<64x128xf32> -> vector<64x128xf32>
    %14 = vector.broadcast %12 : vector<1x128xf32> to vector<64x128xf32>
    %15 = arith.addf %13, %14 : vector<64x128xf32>
    %c0_11 = arith.constant 0 : index
    %c0_12 = arith.constant 0 : index
    %c0_13 = arith.constant 0 : index
    %c0_14 = arith.constant 0 : index
    %16 = vector.load %arg8[%c0_11, %c0_12, %c0_13, %c0_14] : memref<1x2x8x32xf32, #tpu.memory_space<vmem>>, vector<1x1x8x32xf32>
    %17 = vector.shape_cast %16 : vector<1x1x8x32xf32> to vector<8x32xf32>
    %c0_15 = arith.constant 0 : index
    %c0_16 = arith.constant 0 : index
    %c0_17 = arith.constant 0 : index
    %c0_18 = arith.constant 0 : index
    %18 = vector.load %arg9[%c0_15, %c0_16, %c0_17, %c0_18] : memref<1x2x8x32xf32, #tpu.memory_space<vmem>>, vector<1x1x8x32xf32>
    %19 = vector.shape_cast %18 : vector<1x1x8x32xf32> to vector<8x32xf32>
    %20 = vector.extract_strided_slice %15 {offsets = [0, 0], sizes = [8, 128], strides = [1, 1]} : vector<64x128xf32> to vector<8x128xf32>
    %cst_19 = arith.constant dense<0.000000e+00> : vector<8x128xf32>
    %21 = tpu.matmul %17, %11, %cst_19 {dimension_numbers = #tpu.dot_dimension_numbers<[1], [0], [0], [1], [0, 0, 1, 1], [], []>} : vector<8x32xf32>, vector<32x128xf32>, vector<8x128xf32> -> vector<8x128xf32>
    %22 = arith.addf %20, %21 : vector<8x128xf32>
    %cst_20 = arith.constant 5.000000e-01 : f32
    %23 = vector.broadcast %cst_20 : f32 to vector<8x128xf32>
    %24 = arith.mulf %23, %22 : vector<8x128xf32>
    %25 = arith.select %5, %22, %24 : vector<8x128xi1>, vector<8x128xf32>
    %26 = math.tanh %25 : vector<8x128xf32>
    %cst_21 = arith.constant 5.000000e-01 : f32
    %27 = vector.broadcast %cst_21 : f32 to vector<8x128xf32>
    %28 = arith.mulf %27, %26 : vector<8x128xf32>
    %cst_22 = arith.constant 5.000000e-01 : f32
    %29 = vector.broadcast %cst_22 : f32 to vector<8x128xf32>
    %30 = arith.addf %28, %29 : vector<8x128xf32>
    %31 = arith.select %5, %26, %30 : vector<8x128xi1>, vector<8x128xf32>
    %32 = vector.extract_strided_slice %31 {offsets = [0, 0], sizes = [8, 32], strides = [1, 1]} : vector<8x128xf32> to vector<8x32xf32>
    %33 = vector.extract_strided_slice %31 {offsets = [0, 32], sizes = [8, 32], strides = [1, 1]} : vector<8x128xf32> to vector<8x32xf32>
    %34 = vector.extract_strided_slice %31 {offsets = [0, 64], sizes = [8, 32], strides = [1, 1]} : vector<8x128xf32> to vector<8x32xf32>
    %35 = vector.extract_strided_slice %31 {offsets = [0, 96], sizes = [8, 32], strides = [1, 1]} : vector<8x128xf32> to vector<8x32xf32>
    %36 = arith.mulf %33, %19 : vector<8x32xf32>
    %37 = arith.mulf %32, %34 : vector<8x32xf32>
    %38 = arith.addf %36, %37 : vector<8x32xf32>
    %39 = math.tanh %38 : vector<8x32xf32>
    %40 = arith.mulf %35, %39 : vector<8x32xf32>
    %41 = vector.extract_strided_slice %15 {offsets = [8, 0], sizes = [8, 128], strides = [1, 1]} : vector<64x128xf32> to vector<8x128xf32>
    %cst_23 = arith.constant dense<0.000000e+00> : vector<8x128xf32>
    %42 = tpu.matmul %40, %11, %cst_23 {dimension_numbers = #tpu.dot_dimension_numbers<[1], [0], [0], [1], [0, 0, 1, 1], [], []>} : vector<8x32xf32>, vector<32x128xf32>, vector<8x128xf32> -> vector<8x128xf32>
    %43 = arith.addf %41, %42 : vector<8x128xf32>
    %cst_24 = arith.constant 5.000000e-01 : f32
    %44 = vector.broadcast %cst_24 : f32 to vector<8x128xf32>
    %45 = arith.mulf %44, %43 : vector<8x128xf32>
    %46 = arith.select %5, %43, %45 : vector<8x128xi1>, vector<8x128xf32>
    %47 = math.tanh %46 : vector<8x128xf32>
    %cst_25 = arith.constant 5.000000e-01 : f32
    %48 = vector.broadcast %cst_25 : f32 to vector<8x128xf32>
    %49 = arith.mulf %48, %47 : vector<8x128xf32>
    %cst_26 = arith.constant 5.000000e-01 : f32
    %50 = vector.broadcast %cst_26 : f32 to vector<8x128xf32>
    %51 = arith.addf %49, %50 : vector<8x128xf32>
    %52 = arith.select %5, %47, %51 : vector<8x128xi1>, vector<8x128xf32>
    %53 = vector.extract_strided_slice %52 {offsets = [0, 0], sizes = [8, 32], strides = [1, 1]} : vector<8x128xf32> to vector<8x32xf32>
    %54 = vector.extract_strided_slice %52 {offsets = [0, 32], sizes = [8, 32], strides = [1, 1]} : vector<8x128xf32> to vector<8x32xf32>
    %55 = vector.extract_strided_slice %52 {offsets = [0, 64], sizes = [8, 32], strides = [1, 1]} : vector<8x128xf32> to vector<8x32xf32>
    %56 = vector.extract_strided_slice %52 {offsets = [0, 96], sizes = [8, 32], strides = [1, 1]} : vector<8x128xf32> to vector<8x32xf32>
    %57 = arith.mulf %54, %38 : vector<8x32xf32>
    %58 = arith.mulf %53, %55 : vector<8x32xf32>
    %59 = arith.addf %57, %58 : vector<8x32xf32>
    %60 = math.tanh %59 : vector<8x32xf32>
    %61 = arith.mulf %56, %60 : vector<8x32xf32>
    %62 = vector.extract_strided_slice %15 {offsets = [16, 0], sizes = [8, 128], strides = [1, 1]} : vector<64x128xf32> to vector<8x128xf32>
    %cst_27 = arith.constant dense<0.000000e+00> : vector<8x128xf32>
    %63 = tpu.matmul %61, %11, %cst_27 {dimension_numbers = #tpu.dot_dimension_numbers<[1], [0], [0], [1], [0, 0, 1, 1], [], []>} : vector<8x32xf32>, vector<32x128xf32>, vector<8x128xf32> -> vector<8x128xf32>
    %64 = arith.addf %62, %63 : vector<8x128xf32>
    %cst_28 = arith.constant 5.000000e-01 : f32
    %65 = vector.broadcast %cst_28 : f32 to vector<8x128xf32>
    %66 = arith.mulf %65, %64 : vector<8x128xf32>
    %67 = arith.select %5, %64, %66 : vector<8x128xi1>, vector<8x128xf32>
    %68 = math.tanh %67 : vector<8x128xf32>
    %cst_29 = arith.constant 5.000000e-01 : f32
    %69 = vector.broadcast %cst_29 : f32 to vector<8x128xf32>
    %70 = arith.mulf %69, %68 : vector<8x128xf32>
    %cst_30 = arith.constant 5.000000e-01 : f32
    %71 = vector.broadcast %cst_30 : f32 to vector<8x128xf32>
    %72 = arith.addf %70, %71 : vector<8x128xf32>
    %73 = arith.select %5, %68, %72 : vector<8x128xi1>, vector<8x128xf32>
    %74 = vector.extract_strided_slice %73 {offsets = [0, 0], sizes = [8, 32], strides = [1, 1]} : vector<8x128xf32> to vector<8x32xf32>
    %75 = vector.extract_strided_slice %73 {offsets = [0, 32], sizes = [8, 32], strides = [1, 1]} : vector<8x128xf32> to vector<8x32xf32>
    %76 = vector.extract_strided_slice %73 {offsets = [0, 64], sizes = [8, 32], strides = [1, 1]} : vector<8x128xf32> to vector<8x32xf32>
    %77 = vector.extract_strided_slice %73 {offsets = [0, 96], sizes = [8, 32], strides = [1, 1]} : vector<8x128xf32> to vector<8x32xf32>
    %78 = arith.mulf %75, %59 : vector<8x32xf32>
    %79 = arith.mulf %74, %76 : vector<8x32xf32>
    %80 = arith.addf %78, %79 : vector<8x32xf32>
    %81 = math.tanh %80 : vector<8x32xf32>
    %82 = arith.mulf %77, %81 : vector<8x32xf32>
    %83 = vector.extract_strided_slice %15 {offsets = [24, 0], sizes = [8, 128], strides = [1, 1]} : vector<64x128xf32> to vector<8x128xf32>
    %cst_31 = arith.constant dense<0.000000e+00> : vector<8x128xf32>
    %84 = tpu.matmul %82, %11, %cst_31 {dimension_numbers = #tpu.dot_dimension_numbers<[1], [0], [0], [1], [0, 0, 1, 1], [], []>} : vector<8x32xf32>, vector<32x128xf32>, vector<8x128xf32> -> vector<8x128xf32>
    %85 = arith.addf %83, %84 : vector<8x128xf32>
    %cst_32 = arith.constant 5.000000e-01 : f32
    %86 = vector.broadcast %cst_32 : f32 to vector<8x128xf32>
    %87 = arith.mulf %86, %85 : vector<8x128xf32>
    %88 = arith.select %5, %85, %87 : vector<8x128xi1>, vector<8x128xf32>
    %89 = math.tanh %88 : vector<8x128xf32>
    %cst_33 = arith.constant 5.000000e-01 : f32
    %90 = vector.broadcast %cst_33 : f32 to vector<8x128xf32>
    %91 = arith.mulf %90, %89 : vector<8x128xf32>
    %cst_34 = arith.constant 5.000000e-01 : f32
    %92 = vector.broadcast %cst_34 : f32 to vector<8x128xf32>
    %93 = arith.addf %91, %92 : vector<8x128xf32>
    %94 = arith.select %5, %89, %93 : vector<8x128xi1>, vector<8x128xf32>
    %95 = vector.extract_strided_slice %94 {offsets = [0, 0], sizes = [8, 32], strides = [1, 1]} : vector<8x128xf32> to vector<8x32xf32>
    %96 = vector.extract_strided_slice %94 {offsets = [0, 32], sizes = [8, 32], strides = [1, 1]} : vector<8x128xf32> to vector<8x32xf32>
    %97 = vector.extract_strided_slice %94 {offsets = [0, 64], sizes = [8, 32], strides = [1, 1]} : vector<8x128xf32> to vector<8x32xf32>
    %98 = vector.extract_strided_slice %94 {offsets = [0, 96], sizes = [8, 32], strides = [1, 1]} : vector<8x128xf32> to vector<8x32xf32>
    %99 = arith.mulf %96, %80 : vector<8x32xf32>
    %100 = arith.mulf %95, %97 : vector<8x32xf32>
    %101 = arith.addf %99, %100 : vector<8x32xf32>
    %102 = math.tanh %101 : vector<8x32xf32>
    %103 = arith.mulf %98, %102 : vector<8x32xf32>
    %104 = vector.extract_strided_slice %15 {offsets = [32, 0], sizes = [8, 128], strides = [1, 1]} : vector<64x128xf32> to vector<8x128xf32>
    %cst_35 = arith.constant dense<0.000000e+00> : vector<8x128xf32>
    %105 = tpu.matmul %103, %11, %cst_35 {dimension_numbers = #tpu.dot_dimension_numbers<[1], [0], [0], [1], [0, 0, 1, 1], [], []>} : vector<8x32xf32>, vector<32x128xf32>, vector<8x128xf32> -> vector<8x128xf32>
    %106 = arith.addf %104, %105 : vector<8x128xf32>
    %cst_36 = arith.constant 5.000000e-01 : f32
    %107 = vector.broadcast %cst_36 : f32 to vector<8x128xf32>
    %108 = arith.mulf %107, %106 : vector<8x128xf32>
    %109 = arith.select %5, %106, %108 : vector<8x128xi1>, vector<8x128xf32>
    %110 = math.tanh %109 : vector<8x128xf32>
    %cst_37 = arith.constant 5.000000e-01 : f32
    %111 = vector.broadcast %cst_37 : f32 to vector<8x128xf32>
    %112 = arith.mulf %111, %110 : vector<8x128xf32>
    %cst_38 = arith.constant 5.000000e-01 : f32
    %113 = vector.broadcast %cst_38 : f32 to vector<8x128xf32>
    %114 = arith.addf %112, %113 : vector<8x128xf32>
    %115 = arith.select %5, %110, %114 : vector<8x128xi1>, vector<8x128xf32>
    %116 = vector.extract_strided_slice %115 {offsets = [0, 0], sizes = [8, 32], strides = [1, 1]} : vector<8x128xf32> to vector<8x32xf32>
    %117 = vector.extract_strided_slice %115 {offsets = [0, 32], sizes = [8, 32], strides = [1, 1]} : vector<8x128xf32> to vector<8x32xf32>
    %118 = vector.extract_strided_slice %115 {offsets = [0, 64], sizes = [8, 32], strides = [1, 1]} : vector<8x128xf32> to vector<8x32xf32>
    %119 = vector.extract_strided_slice %115 {offsets = [0, 96], sizes = [8, 32], strides = [1, 1]} : vector<8x128xf32> to vector<8x32xf32>
    %120 = arith.mulf %117, %101 : vector<8x32xf32>
    %121 = arith.mulf %116, %118 : vector<8x32xf32>
    %122 = arith.addf %120, %121 : vector<8x32xf32>
    %123 = math.tanh %122 : vector<8x32xf32>
    %124 = arith.mulf %119, %123 : vector<8x32xf32>
    %125 = vector.extract_strided_slice %15 {offsets = [40, 0], sizes = [8, 128], strides = [1, 1]} : vector<64x128xf32> to vector<8x128xf32>
    %cst_39 = arith.constant dense<0.000000e+00> : vector<8x128xf32>
    %126 = tpu.matmul %124, %11, %cst_39 {dimension_numbers = #tpu.dot_dimension_numbers<[1], [0], [0], [1], [0, 0, 1, 1], [], []>} : vector<8x32xf32>, vector<32x128xf32>, vector<8x128xf32> -> vector<8x128xf32>
    %127 = arith.addf %125, %126 : vector<8x128xf32>
    %cst_40 = arith.constant 5.000000e-01 : f32
    %128 = vector.broadcast %cst_40 : f32 to vector<8x128xf32>
    %129 = arith.mulf %128, %127 : vector<8x128xf32>
    %130 = arith.select %5, %127, %129 : vector<8x128xi1>, vector<8x128xf32>
    %131 = math.tanh %130 : vector<8x128xf32>
    %cst_41 = arith.constant 5.000000e-01 : f32
    %132 = vector.broadcast %cst_41 : f32 to vector<8x128xf32>
    %133 = arith.mulf %132, %131 : vector<8x128xf32>
    %cst_42 = arith.constant 5.000000e-01 : f32
    %134 = vector.broadcast %cst_42 : f32 to vector<8x128xf32>
    %135 = arith.addf %133, %134 : vector<8x128xf32>
    %136 = arith.select %5, %131, %135 : vector<8x128xi1>, vector<8x128xf32>
    %137 = vector.extract_strided_slice %136 {offsets = [0, 0], sizes = [8, 32], strides = [1, 1]} : vector<8x128xf32> to vector<8x32xf32>
    %138 = vector.extract_strided_slice %136 {offsets = [0, 32], sizes = [8, 32], strides = [1, 1]} : vector<8x128xf32> to vector<8x32xf32>
    %139 = vector.extract_strided_slice %136 {offsets = [0, 64], sizes = [8, 32], strides = [1, 1]} : vector<8x128xf32> to vector<8x32xf32>
    %140 = vector.extract_strided_slice %136 {offsets = [0, 96], sizes = [8, 32], strides = [1, 1]} : vector<8x128xf32> to vector<8x32xf32>
    %141 = arith.mulf %138, %122 : vector<8x32xf32>
    %142 = arith.mulf %137, %139 : vector<8x32xf32>
    %143 = arith.addf %141, %142 : vector<8x32xf32>
    %144 = math.tanh %143 : vector<8x32xf32>
    %145 = arith.mulf %140, %144 : vector<8x32xf32>
    %146 = vector.extract_strided_slice %15 {offsets = [48, 0], sizes = [8, 128], strides = [1, 1]} : vector<64x128xf32> to vector<8x128xf32>
    %cst_43 = arith.constant dense<0.000000e+00> : vector<8x128xf32>
    %147 = tpu.matmul %145, %11, %cst_43 {dimension_numbers = #tpu.dot_dimension_numbers<[1], [0], [0], [1], [0, 0, 1, 1], [], []>} : vector<8x32xf32>, vector<32x128xf32>, vector<8x128xf32> -> vector<8x128xf32>
    %148 = arith.addf %146, %147 : vector<8x128xf32>
    %cst_44 = arith.constant 5.000000e-01 : f32
    %149 = vector.broadcast %cst_44 : f32 to vector<8x128xf32>
    %150 = arith.mulf %149, %148 : vector<8x128xf32>
    %151 = arith.select %5, %148, %150 : vector<8x128xi1>, vector<8x128xf32>
    %152 = math.tanh %151 : vector<8x128xf32>
    %cst_45 = arith.constant 5.000000e-01 : f32
    %153 = vector.broadcast %cst_45 : f32 to vector<8x128xf32>
    %154 = arith.mulf %153, %152 : vector<8x128xf32>
    %cst_46 = arith.constant 5.000000e-01 : f32
    %155 = vector.broadcast %cst_46 : f32 to vector<8x128xf32>
    %156 = arith.addf %154, %155 : vector<8x128xf32>
    %157 = arith.select %5, %152, %156 : vector<8x128xi1>, vector<8x128xf32>
    %158 = vector.extract_strided_slice %157 {offsets = [0, 0], sizes = [8, 32], strides = [1, 1]} : vector<8x128xf32> to vector<8x32xf32>
    %159 = vector.extract_strided_slice %157 {offsets = [0, 32], sizes = [8, 32], strides = [1, 1]} : vector<8x128xf32> to vector<8x32xf32>
    %160 = vector.extract_strided_slice %157 {offsets = [0, 64], sizes = [8, 32], strides = [1, 1]} : vector<8x128xf32> to vector<8x32xf32>
    %161 = vector.extract_strided_slice %157 {offsets = [0, 96], sizes = [8, 32], strides = [1, 1]} : vector<8x128xf32> to vector<8x32xf32>
    %162 = arith.mulf %159, %143 : vector<8x32xf32>
    %163 = arith.mulf %158, %160 : vector<8x32xf32>
    %164 = arith.addf %162, %163 : vector<8x32xf32>
    %165 = math.tanh %164 : vector<8x32xf32>
    %166 = arith.mulf %161, %165 : vector<8x32xf32>
    %167 = vector.extract_strided_slice %15 {offsets = [56, 0], sizes = [8, 128], strides = [1, 1]} : vector<64x128xf32> to vector<8x128xf32>
    %cst_47 = arith.constant dense<0.000000e+00> : vector<8x128xf32>
    %168 = tpu.matmul %166, %11, %cst_47 {dimension_numbers = #tpu.dot_dimension_numbers<[1], [0], [0], [1], [0, 0, 1, 1], [], []>} : vector<8x32xf32>, vector<32x128xf32>, vector<8x128xf32> -> vector<8x128xf32>
    %169 = arith.addf %167, %168 : vector<8x128xf32>
    %cst_48 = arith.constant 5.000000e-01 : f32
    %170 = vector.broadcast %cst_48 : f32 to vector<8x128xf32>
    %171 = arith.mulf %170, %169 : vector<8x128xf32>
    %172 = arith.select %5, %169, %171 : vector<8x128xi1>, vector<8x128xf32>
    %173 = math.tanh %172 : vector<8x128xf32>
    %cst_49 = arith.constant 5.000000e-01 : f32
    %174 = vector.broadcast %cst_49 : f32 to vector<8x128xf32>
    %175 = arith.mulf %174, %173 : vector<8x128xf32>
    %cst_50 = arith.constant 5.000000e-01 : f32
    %176 = vector.broadcast %cst_50 : f32 to vector<8x128xf32>
    %177 = arith.addf %175, %176 : vector<8x128xf32>
    %178 = arith.select %5, %173, %177 : vector<8x128xi1>, vector<8x128xf32>
    %179 = vector.extract_strided_slice %178 {offsets = [0, 0], sizes = [8, 32], strides = [1, 1]} : vector<8x128xf32> to vector<8x32xf32>
    %180 = vector.extract_strided_slice %178 {offsets = [0, 32], sizes = [8, 32], strides = [1, 1]} : vector<8x128xf32> to vector<8x32xf32>
    %181 = vector.extract_strided_slice %178 {offsets = [0, 64], sizes = [8, 32], strides = [1, 1]} : vector<8x128xf32> to vector<8x32xf32>
    %182 = vector.extract_strided_slice %178 {offsets = [0, 96], sizes = [8, 32], strides = [1, 1]} : vector<8x128xf32> to vector<8x32xf32>
    %183 = arith.mulf %180, %164 : vector<8x32xf32>
    %184 = arith.mulf %179, %181 : vector<8x32xf32>
    %185 = arith.addf %183, %184 : vector<8x32xf32>
    %186 = math.tanh %185 : vector<8x32xf32>
    %187 = arith.mulf %182, %186 : vector<8x32xf32>
    %188 = tpu.concatenate %40, %61, %82, %103, %124, %145, %166, %187 in 0 : vector<8x32xf32>, vector<8x32xf32>, vector<8x32xf32>, vector<8x32xf32>, vector<8x32xf32>, vector<8x32xf32>, vector<8x32xf32>, vector<8x32xf32> -> vector<64x32xf32>
    %c0_51 = arith.constant 0 : index
    %c0_52 = arith.constant 0 : index
    %189 = vector.load %arg5[%c0_51, %c0_52] : memref<32x128xf32, #tpu.memory_space<vmem>>, vector<32x128xf32>
    %c0_53 = arith.constant 0 : index
    %c0_54 = arith.constant 0 : index
    %190 = vector.load %arg6[%c0_53, %c0_54] : memref<32x128xf32, #tpu.memory_space<vmem>>, vector<32x128xf32>
    %c0_55 = arith.constant 0 : index
    %c0_56 = arith.constant 0 : index
    %191 = vector.load %arg7[%c0_55, %c0_56] : memref<1x128xf32, #tpu.memory_space<vmem>>, vector<1x128xf32>
    %cst_57 = arith.constant dense<0.000000e+00> : vector<64x128xf32>
    %192 = tpu.matmul %188, %189, %cst_57 {dimension_numbers = #tpu.dot_dimension_numbers<[1], [0], [0], [1], [0, 0, 1, 1], [], []>} : vector<64x32xf32>, vector<32x128xf32>, vector<64x128xf32> -> vector<64x128xf32>
    %193 = vector.broadcast %191 : vector<1x128xf32> to vector<64x128xf32>
    %194 = arith.addf %192, %193 : vector<64x128xf32>
    %c0_58 = arith.constant 0 : index
    %c1 = arith.constant 1 : index
    %c0_59 = arith.constant 0 : index
    %c0_60 = arith.constant 0 : index
    %195 = vector.load %arg8[%c0_58, %c1, %c0_59, %c0_60] : memref<1x2x8x32xf32, #tpu.memory_space<vmem>>, vector<1x1x8x32xf32>
    %196 = vector.shape_cast %195 : vector<1x1x8x32xf32> to vector<8x32xf32>
    %c0_61 = arith.constant 0 : index
    %c1_62 = arith.constant 1 : index
    %c0_63 = arith.constant 0 : index
    %c0_64 = arith.constant 0 : index
    %197 = vector.load %arg9[%c0_61, %c1_62, %c0_63, %c0_64] : memref<1x2x8x32xf32, #tpu.memory_space<vmem>>, vector<1x1x8x32xf32>
    %198 = vector.shape_cast %197 : vector<1x1x8x32xf32> to vector<8x32xf32>
    %199 = vector.extract_strided_slice %194 {offsets = [0, 0], sizes = [8, 128], strides = [1, 1]} : vector<64x128xf32> to vector<8x128xf32>
    %cst_65 = arith.constant dense<0.000000e+00> : vector<8x128xf32>
    %200 = tpu.matmul %196, %190, %cst_65 {dimension_numbers = #tpu.dot_dimension_numbers<[1], [0], [0], [1], [0, 0, 1, 1], [], []>} : vector<8x32xf32>, vector<32x128xf32>, vector<8x128xf32> -> vector<8x128xf32>
    %201 = arith.addf %199, %200 : vector<8x128xf32>
    %cst_66 = arith.constant 5.000000e-01 : f32
    %202 = vector.broadcast %cst_66 : f32 to vector<8x128xf32>
    %203 = arith.mulf %202, %201 : vector<8x128xf32>
    %204 = arith.select %5, %201, %203 : vector<8x128xi1>, vector<8x128xf32>
    %205 = math.tanh %204 : vector<8x128xf32>
    %cst_67 = arith.constant 5.000000e-01 : f32
    %206 = vector.broadcast %cst_67 : f32 to vector<8x128xf32>
    %207 = arith.mulf %206, %205 : vector<8x128xf32>
    %cst_68 = arith.constant 5.000000e-01 : f32
    %208 = vector.broadcast %cst_68 : f32 to vector<8x128xf32>
    %209 = arith.addf %207, %208 : vector<8x128xf32>
    %210 = arith.select %5, %205, %209 : vector<8x128xi1>, vector<8x128xf32>
    %211 = vector.extract_strided_slice %210 {offsets = [0, 0], sizes = [8, 32], strides = [1, 1]} : vector<8x128xf32> to vector<8x32xf32>
    %212 = vector.extract_strided_slice %210 {offsets = [0, 32], sizes = [8, 32], strides = [1, 1]} : vector<8x128xf32> to vector<8x32xf32>
    %213 = vector.extract_strided_slice %210 {offsets = [0, 64], sizes = [8, 32], strides = [1, 1]} : vector<8x128xf32> to vector<8x32xf32>
    %214 = vector.extract_strided_slice %210 {offsets = [0, 96], sizes = [8, 32], strides = [1, 1]} : vector<8x128xf32> to vector<8x32xf32>
    %215 = arith.mulf %212, %198 : vector<8x32xf32>
    %216 = arith.mulf %211, %213 : vector<8x32xf32>
    %217 = arith.addf %215, %216 : vector<8x32xf32>
    %218 = math.tanh %217 : vector<8x32xf32>
    %219 = arith.mulf %214, %218 : vector<8x32xf32>
    %220 = vector.broadcast %6 : vector<1x32xf32> to vector<8x32xf32>
    %221 = arith.mulf %219, %220 : vector<8x32xf32>
    %cst_69 = arith.constant dense<0.000000e+00> : vector<8xf32>
    %222 = vector.multi_reduction <add>, %221, %cst_69 [1] : vector<8x32xf32> to vector<8xf32>
    %223 = vector.shape_cast %222 : vector<8xf32> to vector<8x1xf32>
    %c0_70 = arith.constant 0 : index
    %c0_71 = arith.constant 0 : index
    %224 = memref.load %arg11[%c0_70, %c0_71] : memref<1x8xf32, #tpu.memory_space<smem>>
    %225 = vector.broadcast %224 : f32 to vector<8x1xf32>
    %226 = arith.mulf %225, %223 : vector<8x1xf32>
    %227 = arith.addf %9, %226 : vector<8x1xf32>
    %228 = vector.extract_strided_slice %194 {offsets = [8, 0], sizes = [8, 128], strides = [1, 1]} : vector<64x128xf32> to vector<8x128xf32>
    %cst_72 = arith.constant dense<0.000000e+00> : vector<8x128xf32>
    %229 = tpu.matmul %219, %190, %cst_72 {dimension_numbers = #tpu.dot_dimension_numbers<[1], [0], [0], [1], [0, 0, 1, 1], [], []>} : vector<8x32xf32>, vector<32x128xf32>, vector<8x128xf32> -> vector<8x128xf32>
    %230 = arith.addf %228, %229 : vector<8x128xf32>
    %cst_73 = arith.constant 5.000000e-01 : f32
    %231 = vector.broadcast %cst_73 : f32 to vector<8x128xf32>
    %232 = arith.mulf %231, %230 : vector<8x128xf32>
    %233 = arith.select %5, %230, %232 : vector<8x128xi1>, vector<8x128xf32>
    %234 = math.tanh %233 : vector<8x128xf32>
    %cst_74 = arith.constant 5.000000e-01 : f32
    %235 = vector.broadcast %cst_74 : f32 to vector<8x128xf32>
    %236 = arith.mulf %235, %234 : vector<8x128xf32>
    %cst_75 = arith.constant 5.000000e-01 : f32
    %237 = vector.broadcast %cst_75 : f32 to vector<8x128xf32>
    %238 = arith.addf %236, %237 : vector<8x128xf32>
    %239 = arith.select %5, %234, %238 : vector<8x128xi1>, vector<8x128xf32>
    %240 = vector.extract_strided_slice %239 {offsets = [0, 0], sizes = [8, 32], strides = [1, 1]} : vector<8x128xf32> to vector<8x32xf32>
    %241 = vector.extract_strided_slice %239 {offsets = [0, 32], sizes = [8, 32], strides = [1, 1]} : vector<8x128xf32> to vector<8x32xf32>
    %242 = vector.extract_strided_slice %239 {offsets = [0, 64], sizes = [8, 32], strides = [1, 1]} : vector<8x128xf32> to vector<8x32xf32>
    %243 = vector.extract_strided_slice %239 {offsets = [0, 96], sizes = [8, 32], strides = [1, 1]} : vector<8x128xf32> to vector<8x32xf32>
    %244 = arith.mulf %241, %217 : vector<8x32xf32>
    %245 = arith.mulf %240, %242 : vector<8x32xf32>
    %246 = arith.addf %244, %245 : vector<8x32xf32>
    %247 = math.tanh %246 : vector<8x32xf32>
    %248 = arith.mulf %243, %247 : vector<8x32xf32>
    %249 = vector.broadcast %6 : vector<1x32xf32> to vector<8x32xf32>
    %250 = arith.mulf %248, %249 : vector<8x32xf32>
    %cst_76 = arith.constant dense<0.000000e+00> : vector<8xf32>
    %251 = vector.multi_reduction <add>, %250, %cst_76 [1] : vector<8x32xf32> to vector<8xf32>
    %252 = vector.shape_cast %251 : vector<8xf32> to vector<8x1xf32>
    %c0_77 = arith.constant 0 : index
    %c1_78 = arith.constant 1 : index
    %253 = memref.load %arg11[%c0_77, %c1_78] : memref<1x8xf32, #tpu.memory_space<smem>>
    %254 = vector.broadcast %253 : f32 to vector<8x1xf32>
    %255 = arith.mulf %254, %252 : vector<8x1xf32>
    %256 = arith.addf %227, %255 : vector<8x1xf32>
    %257 = vector.extract_strided_slice %194 {offsets = [16, 0], sizes = [8, 128], strides = [1, 1]} : vector<64x128xf32> to vector<8x128xf32>
    %cst_79 = arith.constant dense<0.000000e+00> : vector<8x128xf32>
    %258 = tpu.matmul %248, %190, %cst_79 {dimension_numbers = #tpu.dot_dimension_numbers<[1], [0], [0], [1], [0, 0, 1, 1], [], []>} : vector<8x32xf32>, vector<32x128xf32>, vector<8x128xf32> -> vector<8x128xf32>
    %259 = arith.addf %257, %258 : vector<8x128xf32>
    %cst_80 = arith.constant 5.000000e-01 : f32
    %260 = vector.broadcast %cst_80 : f32 to vector<8x128xf32>
    %261 = arith.mulf %260, %259 : vector<8x128xf32>
    %262 = arith.select %5, %259, %261 : vector<8x128xi1>, vector<8x128xf32>
    %263 = math.tanh %262 : vector<8x128xf32>
    %cst_81 = arith.constant 5.000000e-01 : f32
    %264 = vector.broadcast %cst_81 : f32 to vector<8x128xf32>
    %265 = arith.mulf %264, %263 : vector<8x128xf32>
    %cst_82 = arith.constant 5.000000e-01 : f32
    %266 = vector.broadcast %cst_82 : f32 to vector<8x128xf32>
    %267 = arith.addf %265, %266 : vector<8x128xf32>
    %268 = arith.select %5, %263, %267 : vector<8x128xi1>, vector<8x128xf32>
    %269 = vector.extract_strided_slice %268 {offsets = [0, 0], sizes = [8, 32], strides = [1, 1]} : vector<8x128xf32> to vector<8x32xf32>
    %270 = vector.extract_strided_slice %268 {offsets = [0, 32], sizes = [8, 32], strides = [1, 1]} : vector<8x128xf32> to vector<8x32xf32>
    %271 = vector.extract_strided_slice %268 {offsets = [0, 64], sizes = [8, 32], strides = [1, 1]} : vector<8x128xf32> to vector<8x32xf32>
    %272 = vector.extract_strided_slice %268 {offsets = [0, 96], sizes = [8, 32], strides = [1, 1]} : vector<8x128xf32> to vector<8x32xf32>
    %273 = arith.mulf %270, %246 : vector<8x32xf32>
    %274 = arith.mulf %269, %271 : vector<8x32xf32>
    %275 = arith.addf %273, %274 : vector<8x32xf32>
    %276 = math.tanh %275 : vector<8x32xf32>
    %277 = arith.mulf %272, %276 : vector<8x32xf32>
    %278 = vector.broadcast %6 : vector<1x32xf32> to vector<8x32xf32>
    %279 = arith.mulf %277, %278 : vector<8x32xf32>
    %cst_83 = arith.constant dense<0.000000e+00> : vector<8xf32>
    %280 = vector.multi_reduction <add>, %279, %cst_83 [1] : vector<8x32xf32> to vector<8xf32>
    %281 = vector.shape_cast %280 : vector<8xf32> to vector<8x1xf32>
    %c0_84 = arith.constant 0 : index
    %c2 = arith.constant 2 : index
    %282 = memref.load %arg11[%c0_84, %c2] : memref<1x8xf32, #tpu.memory_space<smem>>
    %283 = vector.broadcast %282 : f32 to vector<8x1xf32>
    %284 = arith.mulf %283, %281 : vector<8x1xf32>
    %285 = arith.addf %256, %284 : vector<8x1xf32>
    %286 = vector.extract_strided_slice %194 {offsets = [24, 0], sizes = [8, 128], strides = [1, 1]} : vector<64x128xf32> to vector<8x128xf32>
    %cst_85 = arith.constant dense<0.000000e+00> : vector<8x128xf32>
    %287 = tpu.matmul %277, %190, %cst_85 {dimension_numbers = #tpu.dot_dimension_numbers<[1], [0], [0], [1], [0, 0, 1, 1], [], []>} : vector<8x32xf32>, vector<32x128xf32>, vector<8x128xf32> -> vector<8x128xf32>
    %288 = arith.addf %286, %287 : vector<8x128xf32>
    %cst_86 = arith.constant 5.000000e-01 : f32
    %289 = vector.broadcast %cst_86 : f32 to vector<8x128xf32>
    %290 = arith.mulf %289, %288 : vector<8x128xf32>
    %291 = arith.select %5, %288, %290 : vector<8x128xi1>, vector<8x128xf32>
    %292 = math.tanh %291 : vector<8x128xf32>
    %cst_87 = arith.constant 5.000000e-01 : f32
    %293 = vector.broadcast %cst_87 : f32 to vector<8x128xf32>
    %294 = arith.mulf %293, %292 : vector<8x128xf32>
    %cst_88 = arith.constant 5.000000e-01 : f32
    %295 = vector.broadcast %cst_88 : f32 to vector<8x128xf32>
    %296 = arith.addf %294, %295 : vector<8x128xf32>
    %297 = arith.select %5, %292, %296 : vector<8x128xi1>, vector<8x128xf32>
    %298 = vector.extract_strided_slice %297 {offsets = [0, 0], sizes = [8, 32], strides = [1, 1]} : vector<8x128xf32> to vector<8x32xf32>
    %299 = vector.extract_strided_slice %297 {offsets = [0, 32], sizes = [8, 32], strides = [1, 1]} : vector<8x128xf32> to vector<8x32xf32>
    %300 = vector.extract_strided_slice %297 {offsets = [0, 64], sizes = [8, 32], strides = [1, 1]} : vector<8x128xf32> to vector<8x32xf32>
    %301 = vector.extract_strided_slice %297 {offsets = [0, 96], sizes = [8, 32], strides = [1, 1]} : vector<8x128xf32> to vector<8x32xf32>
    %302 = arith.mulf %299, %275 : vector<8x32xf32>
    %303 = arith.mulf %298, %300 : vector<8x32xf32>
    %304 = arith.addf %302, %303 : vector<8x32xf32>
    %305 = math.tanh %304 : vector<8x32xf32>
    %306 = arith.mulf %301, %305 : vector<8x32xf32>
    %307 = vector.broadcast %6 : vector<1x32xf32> to vector<8x32xf32>
    %308 = arith.mulf %306, %307 : vector<8x32xf32>
    %cst_89 = arith.constant dense<0.000000e+00> : vector<8xf32>
    %309 = vector.multi_reduction <add>, %308, %cst_89 [1] : vector<8x32xf32> to vector<8xf32>
    %310 = vector.shape_cast %309 : vector<8xf32> to vector<8x1xf32>
    %c0_90 = arith.constant 0 : index
    %c3 = arith.constant 3 : index
    %311 = memref.load %arg11[%c0_90, %c3] : memref<1x8xf32, #tpu.memory_space<smem>>
    %312 = vector.broadcast %311 : f32 to vector<8x1xf32>
    %313 = arith.mulf %312, %310 : vector<8x1xf32>
    %314 = arith.addf %285, %313 : vector<8x1xf32>
    %315 = vector.extract_strided_slice %194 {offsets = [32, 0], sizes = [8, 128], strides = [1, 1]} : vector<64x128xf32> to vector<8x128xf32>
    %cst_91 = arith.constant dense<0.000000e+00> : vector<8x128xf32>
    %316 = tpu.matmul %306, %190, %cst_91 {dimension_numbers = #tpu.dot_dimension_numbers<[1], [0], [0], [1], [0, 0, 1, 1], [], []>} : vector<8x32xf32>, vector<32x128xf32>, vector<8x128xf32> -> vector<8x128xf32>
    %317 = arith.addf %315, %316 : vector<8x128xf32>
    %cst_92 = arith.constant 5.000000e-01 : f32
    %318 = vector.broadcast %cst_92 : f32 to vector<8x128xf32>
    %319 = arith.mulf %318, %317 : vector<8x128xf32>
    %320 = arith.select %5, %317, %319 : vector<8x128xi1>, vector<8x128xf32>
    %321 = math.tanh %320 : vector<8x128xf32>
    %cst_93 = arith.constant 5.000000e-01 : f32
    %322 = vector.broadcast %cst_93 : f32 to vector<8x128xf32>
    %323 = arith.mulf %322, %321 : vector<8x128xf32>
    %cst_94 = arith.constant 5.000000e-01 : f32
    %324 = vector.broadcast %cst_94 : f32 to vector<8x128xf32>
    %325 = arith.addf %323, %324 : vector<8x128xf32>
    %326 = arith.select %5, %321, %325 : vector<8x128xi1>, vector<8x128xf32>
    %327 = vector.extract_strided_slice %326 {offsets = [0, 0], sizes = [8, 32], strides = [1, 1]} : vector<8x128xf32> to vector<8x32xf32>
    %328 = vector.extract_strided_slice %326 {offsets = [0, 32], sizes = [8, 32], strides = [1, 1]} : vector<8x128xf32> to vector<8x32xf32>
    %329 = vector.extract_strided_slice %326 {offsets = [0, 64], sizes = [8, 32], strides = [1, 1]} : vector<8x128xf32> to vector<8x32xf32>
    %330 = vector.extract_strided_slice %326 {offsets = [0, 96], sizes = [8, 32], strides = [1, 1]} : vector<8x128xf32> to vector<8x32xf32>
    %331 = arith.mulf %328, %304 : vector<8x32xf32>
    %332 = arith.mulf %327, %329 : vector<8x32xf32>
    %333 = arith.addf %331, %332 : vector<8x32xf32>
    %334 = math.tanh %333 : vector<8x32xf32>
    %335 = arith.mulf %330, %334 : vector<8x32xf32>
    %336 = vector.broadcast %6 : vector<1x32xf32> to vector<8x32xf32>
    %337 = arith.mulf %335, %336 : vector<8x32xf32>
    %cst_95 = arith.constant dense<0.000000e+00> : vector<8xf32>
    %338 = vector.multi_reduction <add>, %337, %cst_95 [1] : vector<8x32xf32> to vector<8xf32>
    %339 = vector.shape_cast %338 : vector<8xf32> to vector<8x1xf32>
    %c0_96 = arith.constant 0 : index
    %c4 = arith.constant 4 : index
    %340 = memref.load %arg11[%c0_96, %c4] : memref<1x8xf32, #tpu.memory_space<smem>>
    %341 = vector.broadcast %340 : f32 to vector<8x1xf32>
    %342 = arith.mulf %341, %339 : vector<8x1xf32>
    %343 = arith.addf %314, %342 : vector<8x1xf32>
    %344 = vector.extract_strided_slice %194 {offsets = [40, 0], sizes = [8, 128], strides = [1, 1]} : vector<64x128xf32> to vector<8x128xf32>
    %cst_97 = arith.constant dense<0.000000e+00> : vector<8x128xf32>
    %345 = tpu.matmul %335, %190, %cst_97 {dimension_numbers = #tpu.dot_dimension_numbers<[1], [0], [0], [1], [0, 0, 1, 1], [], []>} : vector<8x32xf32>, vector<32x128xf32>, vector<8x128xf32> -> vector<8x128xf32>
    %346 = arith.addf %344, %345 : vector<8x128xf32>
    %cst_98 = arith.constant 5.000000e-01 : f32
    %347 = vector.broadcast %cst_98 : f32 to vector<8x128xf32>
    %348 = arith.mulf %347, %346 : vector<8x128xf32>
    %349 = arith.select %5, %346, %348 : vector<8x128xi1>, vector<8x128xf32>
    %350 = math.tanh %349 : vector<8x128xf32>
    %cst_99 = arith.constant 5.000000e-01 : f32
    %351 = vector.broadcast %cst_99 : f32 to vector<8x128xf32>
    %352 = arith.mulf %351, %350 : vector<8x128xf32>
    %cst_100 = arith.constant 5.000000e-01 : f32
    %353 = vector.broadcast %cst_100 : f32 to vector<8x128xf32>
    %354 = arith.addf %352, %353 : vector<8x128xf32>
    %355 = arith.select %5, %350, %354 : vector<8x128xi1>, vector<8x128xf32>
    %356 = vector.extract_strided_slice %355 {offsets = [0, 0], sizes = [8, 32], strides = [1, 1]} : vector<8x128xf32> to vector<8x32xf32>
    %357 = vector.extract_strided_slice %355 {offsets = [0, 32], sizes = [8, 32], strides = [1, 1]} : vector<8x128xf32> to vector<8x32xf32>
    %358 = vector.extract_strided_slice %355 {offsets = [0, 64], sizes = [8, 32], strides = [1, 1]} : vector<8x128xf32> to vector<8x32xf32>
    %359 = vector.extract_strided_slice %355 {offsets = [0, 96], sizes = [8, 32], strides = [1, 1]} : vector<8x128xf32> to vector<8x32xf32>
    %360 = arith.mulf %357, %333 : vector<8x32xf32>
    %361 = arith.mulf %356, %358 : vector<8x32xf32>
    %362 = arith.addf %360, %361 : vector<8x32xf32>
    %363 = math.tanh %362 : vector<8x32xf32>
    %364 = arith.mulf %359, %363 : vector<8x32xf32>
    %365 = vector.broadcast %6 : vector<1x32xf32> to vector<8x32xf32>
    %366 = arith.mulf %364, %365 : vector<8x32xf32>
    %cst_101 = arith.constant dense<0.000000e+00> : vector<8xf32>
    %367 = vector.multi_reduction <add>, %366, %cst_101 [1] : vector<8x32xf32> to vector<8xf32>
    %368 = vector.shape_cast %367 : vector<8xf32> to vector<8x1xf32>
    %c0_102 = arith.constant 0 : index
    %c5 = arith.constant 5 : index
    %369 = memref.load %arg11[%c0_102, %c5] : memref<1x8xf32, #tpu.memory_space<smem>>
    %370 = vector.broadcast %369 : f32 to vector<8x1xf32>
    %371 = arith.mulf %370, %368 : vector<8x1xf32>
    %372 = arith.addf %343, %371 : vector<8x1xf32>
    %373 = vector.extract_strided_slice %194 {offsets = [48, 0], sizes = [8, 128], strides = [1, 1]} : vector<64x128xf32> to vector<8x128xf32>
    %cst_103 = arith.constant dense<0.000000e+00> : vector<8x128xf32>
    %374 = tpu.matmul %364, %190, %cst_103 {dimension_numbers = #tpu.dot_dimension_numbers<[1], [0], [0], [1], [0, 0, 1, 1], [], []>} : vector<8x32xf32>, vector<32x128xf32>, vector<8x128xf32> -> vector<8x128xf32>
    %375 = arith.addf %373, %374 : vector<8x128xf32>
    %cst_104 = arith.constant 5.000000e-01 : f32
    %376 = vector.broadcast %cst_104 : f32 to vector<8x128xf32>
    %377 = arith.mulf %376, %375 : vector<8x128xf32>
    %378 = arith.select %5, %375, %377 : vector<8x128xi1>, vector<8x128xf32>
    %379 = math.tanh %378 : vector<8x128xf32>
    %cst_105 = arith.constant 5.000000e-01 : f32
    %380 = vector.broadcast %cst_105 : f32 to vector<8x128xf32>
    %381 = arith.mulf %380, %379 : vector<8x128xf32>
    %cst_106 = arith.constant 5.000000e-01 : f32
    %382 = vector.broadcast %cst_106 : f32 to vector<8x128xf32>
    %383 = arith.addf %381, %382 : vector<8x128xf32>
    %384 = arith.select %5, %379, %383 : vector<8x128xi1>, vector<8x128xf32>
    %385 = vector.extract_strided_slice %384 {offsets = [0, 0], sizes = [8, 32], strides = [1, 1]} : vector<8x128xf32> to vector<8x32xf32>
    %386 = vector.extract_strided_slice %384 {offsets = [0, 32], sizes = [8, 32], strides = [1, 1]} : vector<8x128xf32> to vector<8x32xf32>
    %387 = vector.extract_strided_slice %384 {offsets = [0, 64], sizes = [8, 32], strides = [1, 1]} : vector<8x128xf32> to vector<8x32xf32>
    %388 = vector.extract_strided_slice %384 {offsets = [0, 96], sizes = [8, 32], strides = [1, 1]} : vector<8x128xf32> to vector<8x32xf32>
    %389 = arith.mulf %386, %362 : vector<8x32xf32>
    %390 = arith.mulf %385, %387 : vector<8x32xf32>
    %391 = arith.addf %389, %390 : vector<8x32xf32>
    %392 = math.tanh %391 : vector<8x32xf32>
    %393 = arith.mulf %388, %392 : vector<8x32xf32>
    %394 = vector.broadcast %6 : vector<1x32xf32> to vector<8x32xf32>
    %395 = arith.mulf %393, %394 : vector<8x32xf32>
    %cst_107 = arith.constant dense<0.000000e+00> : vector<8xf32>
    %396 = vector.multi_reduction <add>, %395, %cst_107 [1] : vector<8x32xf32> to vector<8xf32>
    %397 = vector.shape_cast %396 : vector<8xf32> to vector<8x1xf32>
    %c0_108 = arith.constant 0 : index
    %c6 = arith.constant 6 : index
    %398 = memref.load %arg11[%c0_108, %c6] : memref<1x8xf32, #tpu.memory_space<smem>>
    %399 = vector.broadcast %398 : f32 to vector<8x1xf32>
    %400 = arith.mulf %399, %397 : vector<8x1xf32>
    %401 = arith.addf %372, %400 : vector<8x1xf32>
    %402 = vector.extract_strided_slice %194 {offsets = [56, 0], sizes = [8, 128], strides = [1, 1]} : vector<64x128xf32> to vector<8x128xf32>
    %cst_109 = arith.constant dense<0.000000e+00> : vector<8x128xf32>
    %403 = tpu.matmul %393, %190, %cst_109 {dimension_numbers = #tpu.dot_dimension_numbers<[1], [0], [0], [1], [0, 0, 1, 1], [], []>} : vector<8x32xf32>, vector<32x128xf32>, vector<8x128xf32> -> vector<8x128xf32>
    %404 = arith.addf %402, %403 : vector<8x128xf32>
    %cst_110 = arith.constant 5.000000e-01 : f32
    %405 = vector.broadcast %cst_110 : f32 to vector<8x128xf32>
    %406 = arith.mulf %405, %404 : vector<8x128xf32>
    %407 = arith.select %5, %404, %406 : vector<8x128xi1>, vector<8x128xf32>
    %408 = math.tanh %407 : vector<8x128xf32>
    %cst_111 = arith.constant 5.000000e-01 : f32
    %409 = vector.broadcast %cst_111 : f32 to vector<8x128xf32>
    %410 = arith.mulf %409, %408 : vector<8x128xf32>
    %cst_112 = arith.constant 5.000000e-01 : f32
    %411 = vector.broadcast %cst_112 : f32 to vector<8x128xf32>
    %412 = arith.addf %410, %411 : vector<8x128xf32>
    %413 = arith.select %5, %408, %412 : vector<8x128xi1>, vector<8x128xf32>
    %414 = vector.extract_strided_slice %413 {offsets = [0, 0], sizes = [8, 32], strides = [1, 1]} : vector<8x128xf32> to vector<8x32xf32>
    %415 = vector.extract_strided_slice %413 {offsets = [0, 32], sizes = [8, 32], strides = [1, 1]} : vector<8x128xf32> to vector<8x32xf32>
    %416 = vector.extract_strided_slice %413 {offsets = [0, 64], sizes = [8, 32], strides = [1, 1]} : vector<8x128xf32> to vector<8x32xf32>
    %417 = vector.extract_strided_slice %413 {offsets = [0, 96], sizes = [8, 32], strides = [1, 1]} : vector<8x128xf32> to vector<8x32xf32>
    %418 = arith.mulf %415, %391 : vector<8x32xf32>
    %419 = arith.mulf %414, %416 : vector<8x32xf32>
    %420 = arith.addf %418, %419 : vector<8x32xf32>
    %421 = math.tanh %420 : vector<8x32xf32>
    %422 = arith.mulf %417, %421 : vector<8x32xf32>
    %423 = vector.broadcast %6 : vector<1x32xf32> to vector<8x32xf32>
    %424 = arith.mulf %422, %423 : vector<8x32xf32>
    %cst_113 = arith.constant dense<0.000000e+00> : vector<8xf32>
    %425 = vector.multi_reduction <add>, %424, %cst_113 [1] : vector<8x32xf32> to vector<8xf32>
    %426 = vector.shape_cast %425 : vector<8xf32> to vector<8x1xf32>
    %c0_114 = arith.constant 0 : index
    %c7 = arith.constant 7 : index
    %427 = memref.load %arg11[%c0_114, %c7] : memref<1x8xf32, #tpu.memory_space<smem>>
    %428 = vector.broadcast %427 : f32 to vector<8x1xf32>
    %429 = arith.mulf %428, %426 : vector<8x1xf32>
    %430 = arith.addf %401, %429 : vector<8x1xf32>
    %c0_115 = arith.constant 0 : index
    %c0_116 = arith.constant 0 : index
    %431 = memref.load %arg12[%c0_115, %c0_116] : memref<1x1xf32, #tpu.memory_space<smem>>
    %432 = vector.broadcast %431 : f32 to vector<8x1xf32>
    %433 = arith.addf %430, %432 : vector<8x1xf32>
    %434 = arith.negf %433 : vector<8x1xf32>
    %435 = math.exp %434 : vector<8x1xf32>
    %cst_117 = arith.constant 1.000000e+00 : f32
    %436 = vector.broadcast %cst_117 : f32 to vector<8x1xf32>
    %437 = arith.addf %436, %435 : vector<8x1xf32>
    %438 = arith.divf %436, %437 : vector<8x1xf32>
    %c0_118 = arith.constant 0 : index
    %c0_119 = arith.constant 0 : index
    %c0_120 = arith.constant 0 : index
    %439 = vector.load %arg13[%c0_118, %c0_119, %c0_120] : memref<1x8x1xf32, #tpu.memory_space<vmem>>, vector<1x8x1xf32>
    %440 = vector.shape_cast %439 : vector<1x8x1xf32> to vector<8x1xf32>
    %441 = vector.shape_cast %438 : vector<8x1xf32> to vector<1x8x1xf32>
    tpu.vector_store %arg13[%c0_118, %c0_119, %c0_120], %441 {strides = array<i32>} : memref<1x8x1xf32, #tpu.memory_space<vmem>>, vector<1x8x1xf32>,
    return
  }
  func.func @transform_0(%arg0: i32) -> (i32, i32, i32) {
    %c0_i32 = arith.constant 0 : i32
    %c0_i32_0 = arith.constant 0 : i32
    %c0_i32_1 = arith.constant 0 : i32
    return %arg0, %c0_i32, %c0_i32_0 : i32, i32, i32
  }
  func.func @transform_1(%arg0: i32) -> (i32, i32) {
    %c0_i32 = arith.constant 0 : i32
    %c0_i32_0 = arith.constant 0 : i32
    %c0_i32_1 = arith.constant 0 : i32
    return %c0_i32, %c0_i32_0 : i32, i32
  }
  func.func @transform_2(%arg0: i32) -> (i32, i32) {
    %c0_i32 = arith.constant 0 : i32
    %c0_i32_0 = arith.constant 0 : i32
    %c0_i32_1 = arith.constant 0 : i32
    return %c0_i32, %c0_i32_0 : i32, i32
  }
  func.func @transform_3(%arg0: i32) -> (i32, i32) {
    %c0_i32 = arith.constant 0 : i32
    %c0_i32_0 = arith.constant 0 : i32
    %c0_i32_1 = arith.constant 0 : i32
    return %c0_i32, %c0_i32_0 : i32, i32
  }
  func.func @transform_4(%arg0: i32) -> (i32, i32) {
    %c0_i32 = arith.constant 0 : i32
    %c0_i32_0 = arith.constant 0 : i32
    %c0_i32_1 = arith.constant 0 : i32
    return %c0_i32, %c0_i32_0 : i32, i32
  }
  func.func @transform_5(%arg0: i32) -> (i32, i32) {
    %c0_i32 = arith.constant 0 : i32
    %c0_i32_0 = arith.constant 0 : i32
    %c0_i32_1 = arith.constant 0 : i32
    return %c0_i32, %c0_i32_0 : i32, i32
  }
  func.func @transform_6(%arg0: i32) -> (i32, i32) {
    %c0_i32 = arith.constant 0 : i32
    %c0_i32_0 = arith.constant 0 : i32
    %c0_i32_1 = arith.constant 0 : i32
    return %c0_i32, %c0_i32_0 : i32, i32
  }
  func.func @transform_7(%arg0: i32) -> (i32, i32, i32, i32) {
    %c0_i32 = arith.constant 0 : i32
    %c0_i32_0 = arith.constant 0 : i32
    %c0_i32_1 = arith.constant 0 : i32
    %c0_i32_2 = arith.constant 0 : i32
    return %arg0, %c0_i32, %c0_i32_0, %c0_i32_1 : i32, i32, i32, i32
  }
  func.func @transform_8(%arg0: i32) -> (i32, i32, i32, i32) {
    %c0_i32 = arith.constant 0 : i32
    %c0_i32_0 = arith.constant 0 : i32
    %c0_i32_1 = arith.constant 0 : i32
    %c0_i32_2 = arith.constant 0 : i32
    return %arg0, %c0_i32, %c0_i32_0, %c0_i32_1 : i32, i32, i32, i32
  }
  func.func @transform_9(%arg0: i32) -> (i32, i32) {
    %c0_i32 = arith.constant 0 : i32
    %c0_i32_0 = arith.constant 0 : i32
    %c0_i32_1 = arith.constant 0 : i32
    return %c0_i32, %c0_i32_0 : i32, i32
  }
  func.func @transform_10(%arg0: i32) -> (i32, i32) {
    %c0_i32 = arith.constant 0 : i32
    %c0_i32_0 = arith.constant 0 : i32
    %c0_i32_1 = arith.constant 0 : i32
    return %c0_i32, %c0_i32_0 : i32, i32
  }
  func.func @transform_11(%arg0: i32) -> (i32, i32) {
    %c0_i32 = arith.constant 0 : i32
    %c0_i32_0 = arith.constant 0 : i32
    %c0_i32_1 = arith.constant 0 : i32
    return %c0_i32, %c0_i32_0 : i32, i32
  }
  func.func @transform_12(%arg0: i32) -> (i32, i32, i32) {
    %c0_i32 = arith.constant 0 : i32
    %c0_i32_0 = arith.constant 0 : i32
    %c0_i32_1 = arith.constant 0 : i32
    return %arg0, %c0_i32, %c0_i32_0 : i32, i32, i32
  }
}

</mosaic_0001>

<bundles_post_ra>
// kernel: tpu_custom_call.1
= control target key start
LH: loop header
LB: loop body
LE: loop exit
PB: predicated region body
PF: predicated region fallthrough
CT: control target
= control target key end

     0   :  { %18 = vsyncpa [#allocation4], 0  ;;  %s1858_s0 = inlined_call_operand.vmem [shape: f32[1,64,16], index: 0, kind: input, shape index: {}]   ;;  %s1859_s1 = inlined_call_operand.vmem [shape: f32[16,128], index: 1, kind: input, shape index: {}]   ;;  %s1860_s2 = inlined_call_operand.vmem [shape: f32[32,128], index: 2, kind: input, shape index: {}]   ;;  %s1861_s3 = inlined_call_operand.vmem [shape: f32[1,128], index: 3, kind: input, shape index: {}]   ;;  %s1862_s4 = inlined_call_operand.vmem [shape: f32[32,128], index: 4, kind: input, shape index: {}]   ;;  %s1863_s5 = inlined_call_operand.hbm [shape: f32[32,128], index: 5, kind: input, shape index: {}]   ;;  %s1864_s6 = inlined_call_operand.vmem [shape: f32[1,128], index: 6, kind: input, shape index: {}]   ;;  %s1865_s7 = inlined_call_operand.hbm [shape: f32[1,2,8,32], index: 7, kind: input, shape index: {}]   ;;  %s1866_s8 = inlined_call_operand.hbm [shape: f32[1,2,8,32], index: 8, kind: input, shape index: {}]   ;;  %s1867_s9 = inlined_call_operand.vmem [shape: f32[1,32], index: 9, kind: input, shape index: {}]   ;;  %s1868_s10 = inlined_call_operand.vmem [shape: f32[1,8], index: 10, kind: input, shape index: {}]   ;;  %s1869_s11 = inlined_call_operand.<no memory space> [shape: f32[1,1], index: 11, kind: input, shape index: {}]   ;;  %s1870_s12 = inlined_call_operand.vmem [shape: f32[1,8,1], index: 12, kind: output, shape index: {}]  }
   0x1   :  { %19 = vsyncpa [#allocation7], 0 }
   0x2   :  { %20 = vsyncpa [#allocation5], 0  ;;  %s50_s23 = sshll.u32 %s1865_s7, 4  ;;  %s1387_s24 = smov [#allocation6]   ;;  %s51_s23 = int_to_ptr.hbm [resolvable:$true] %s50_s23 }
   0x3   :  { %s52_s25 = sshll.u32 %s1387_s24, 4  ;;  %s35_s28 = sshll.u32 %s1863_s5, 4  ;;  %s53_s25 = int_to_ptr.vmem [resolvable:$true] %s52_s25  ;;  %s36_s28 = int_to_ptr.hbm [resolvable:$true] %s35_s28 }
   0x4   :  { %s1388_s29 = smov 128   ;;  %s1389_s30 = smov 8  }
   0x5   :  { %58 = dma.hbm_to_vmem [thread:$0]  %s51_s23, 256, %s53_s25, [#allocation7], %s1388_s29, %s1388_s29, %s1389_s30  }
   0x6   :  { %s1390_s13 = smov [#allocation3]   ;;  %s63_s17 = sshll.u32 %s1866_s8, 4  ;;  %s64_s17 = int_to_ptr.hbm [resolvable:$true] %s63_s17 }
   0x7   :  { %s37_s14 = sshll.u32 %s1390_s13, 4  ;;  %s79_s19 = sshll.u32 %s1868_s10, 4  ;;  %s38_s14 = int_to_ptr.vmem [resolvable:$true] %s37_s14  ;;  %s80_s19 = int_to_ptr.vmem [resolvable:$true] %s79_s19 }
   0x8   :  { %43 = dma.hbm_to_vmem [thread:$0]  %s36_s28, 512, %s38_s14, [#allocation4], %s1388_s29, %s1388_s29, %s1389_s30  }
   0x9   :  { %s1391_s20 = smov [#allocation8]   ;;  %s1392_s5 = smov [#allocation9]  }
   0xa   :  { %s65_s21 = sshll.u32 %s1391_s20, 4  ;;  %s66_s21 = int_to_ptr.vmem [resolvable:$true] %s65_s21 }
   0xb   :  { %71 = dma.hbm_to_vmem [thread:$0]  %s64_s17, 256, %s66_s21, [#allocation7], %s1388_s29, %s1388_s29, %s1389_s30  }
   0xc   :  { %82 = dma.vmem_to_smem %s80_s19, 16, %s1392_s5, [#allocation5]  }
   0xd   :  { %1381 = dma.done.wait [#allocation4], 512  }
   0xe   :  { %1382 = vsyncadd [#allocation4], 4294966784 }
   0xf   :  { %1383 = dma.done.wait [#allocation7], 512  }
  0x10   :  { %1384 = vsyncadd [#allocation7], 4294966784 }
  0x11   :  { %1385 = dma.done.wait [#allocation5], 16  }
  0x12   :  { %1386 = vsyncadd [#allocation5], 4294967280 }
  0x13   :  { %101 = sfence }
  0x14   :  { %v1476_v0 = vld [vmem:[%s1860_s2 + $0x18] sm:$0xff]  ;;  %v117_v1 = vld [vmem:[%s1859_s1 + $0x8] sm:$0xff]  ;;  %v1484_v2 = vld [vmem:[%s1860_s2 + $0x10] sm:$0xff]  ;;  %vm126_vm0 = vcmask 130048   ;;  %vm194_vm1 = vcmask 261120   ;;  %v102_v8 = vlaneseq  ;;  %s1394_s16 = smov 32  }
  0x15   :  { %210 = vmatpush.msra.mxu1 %v1476_v0  ;;  %165 = vmatpush.msra.mxu0 %v117_v1  ;;  %v116_v3 = vld [vmem:[%s1859_s1] sm:$0xff]  ;;  %v1496_v5 = vld [vmem:[%s1860_s2 + $0x8] sm:$0xff]  ;;  %v193_v22 = vld [vmem:[#allocation8] sm:$0xff]  ;;  %s1395_s17 = smov 96   ;;  %s1205_s7 = sld [smem:[#allocation9 + $0x2]]  ;;  %vm1168_vm7 = vcmask 7168  }
  0x16   :  { %v108_v4 = vld [vmem:[%s1858_s0] sm:$0xff]  ;;  %263 = vmatpush.msra.mxu2 %v1476_v0  ;;  %v103_v10 = vand.u32 127, %v102_v8  ;;  %v592_v30 = vld [vmem:[%s1862_s4 + $0x18] sm:$0xff]  ;;  %v591_v31 = vld [vmem:[%s1862_s4 + $0x10] sm:$0xff]  ;;  %s1207_s18 = sld [smem:[#allocation9 + $0x3]] }
  0x17   :  { %211 = vmatpush.msra.mxu1 %v1484_v2  ;;  %166 = vmatpush.msra.mxu0 %v116_v3  ;;  %v1504_v6 = vld [vmem:[%s1860_s2] sm:$0xff]  ;;  %v590_v32 = vld [vmem:[%s1862_s4 + $0x8] sm:$0xff]  ;;  %v110_v54 = vld [vmem:[%s1858_s0 + $0x10] sm:$0xff]  ;;  %s1209_s19 = sld [smem:[#allocation9 + $0x4]] }
  0x18   :  { %1177 = vmatmul.msk.f32.vlgmr.msra.gmra.mxu0 %vm126_vm0, %v108_v4  ;;  %264 = vmatpush.msra.mxu2 %v1484_v2  ;;  %v192_v7 = vld [vmem:[#allocation6] sm:$0xff]  ;;  %vm104_vm2 = vcmp.ge.s32.totalorder %v103_v10, 64  ;;  %vm105_vm3 = vcmp.lt.s32.totalorder %v103_v10, 96  ;;  %v109_v36 = vld [vmem:[%s1858_s0 + $0x8] sm:$0xff]  ;;  %s1211_s20 = sld [smem:[#allocation9 + $0x5]] }
  0x19   :  { %212 = vmatpush.msra.mxu1 %v1496_v5  ;;  %v1527_v9 = vld [vmem:[%s1861_s3] ss:$0 sm:$0xff]  ;;  %vm1530_vm4 = vmand %vm104_vm2, %vm105_vm3  ;;  %s1393_s3 = smov 64   ;;  %618 = vmatpush.msra.mxu3 %v592_v30  ;;  %s1215_s21 = sld [smem:[#allocation9 + $0x7]] }
  0x1a   :  { %265 = vmatpush.msra.mxu2 %v1496_v5  ;;  %v589_v33 = vld [vmem:[%s1862_s4] sm:$0xff] }
  0x1b   :  { %213 = vmatpush.msra.mxu1 %v1504_v6  ;;  %619 = vmatpush.msra.mxu3 %v591_v31 }
  0x1c   :  { %1185 = vmatmul.msk.f32.vlgmr.msra.gmra.mxu1 %vm194_vm1, %v192_v7  ;;  %266 = vmatpush.msra.mxu2 %v1504_v6 }
  0x1d   :  { %312 = vmatpush.msrb.mxu1 %v1476_v0  ;;  %620 = vmatpush.msra.mxu3 %v590_v32 }
  0x1e   :  { %410 = vmatpush.msrb.mxu2 %v1476_v0 }
  0x1f   :  { %313 = vmatpush.msrb.mxu1 %v1484_v2  ;;  %621 = vmatpush.msra.mxu3 %v589_v33 }
  0x20   :  { %411 = vmatpush.msrb.mxu2 %v1484_v2  ;;  %1178 = vmatmul.msk.f32.gmra.mxu0 %vm126_vm0, %v109_v36 }
  0x21   :  { %314 = vmatpush.msrb.mxu1 %v1496_v5 }
  0x22   :  { %412 = vmatpush.msrb.mxu2 %v1496_v5 }
  0x23   :  { %315 = vmatpush.msrb.mxu1 %v1504_v6 }
  0x24   :  { %413 = vmatpush.msrb.mxu2 %v1504_v6 }
  0x25   :  { %361 = vmatpush.msra.mxu1 %v1476_v0 }
  0x27   :  { %362 = vmatpush.msra.mxu1 %v1484_v2 }
  0x28   :  { %1179 = vmatmul.msk.f32.gmra.mxu0 %vm126_vm0, %v110_v54  ;;  %v113_v54 = vld [vmem:[%s1858_s0 + $0x28] sm:$0xff] }
  0x29   :  { %363 = vmatpush.msra.mxu1 %v1496_v5 }
  0x2b   :  { %364 = vmatpush.msra.mxu1 %v1504_v6 }
  0x95   :  { %v168_v11 = vpop.f32.mrf.mxu0 }
  0x96   :  { %v169_v12 = vadd.f32 %v1527_v9, %v168_v11 }
  0x99   :  { %v215_v13 = vpop.f32.mrf.mxu1 }
  0x9a   :  { %v218_v14 = vadd.f32 %v215_v13, %v169_v12 }
  0x9c   :  { %v219_v16 = vmul.f32 0.5, %v218_v14 }
  0x9d   :  { %v171_v38 = vpop.f32.mrf.mxu0 }
  0x9e   :  { %v220_v17 = vsel %vm1530_vm4, %v218_v14, %v219_v16  ;;  %v172_v39 = vadd.f32 %v1527_v9, %v171_v38  ;;  %v111_v16 = vld [vmem:[%s1858_s0 + $0x18] sm:$0xff]  ;;  %v112_v38 = vld [vmem:[%s1858_s0 + $0x20] sm:$0xff] }
  0x9f   :  { %1229 = vtanh.f32 %v220_v17  ;;  %1180 = vmatmul.msk.f32.gmra.mxu0 %vm126_vm0, %v111_v16 }
  0xa5   :  { %v1230_v18 = vpop.eup %1229  ;;  %v174_v58 = vpop.f32.mrf.mxu0 }
  0xa6   :  { %v222_v19 = vmul.f32 0.5, %v1230_v18  ;;  %v175_v59 = vadd.f32 %v1527_v9, %v174_v58 }
  0xa7   :  { %1181 = vmatmul.msk.f32.gmra.mxu0 %vm126_vm0, %v112_v38 }
  0xa8   :  { %v223_v20 = vadd.f32 0.5, %v222_v19 }
  0xaa   :  { %v224_v21 = vsel %vm1530_vm4, %v1230_v18, %v223_v20 }
  0xab   :  { %231 = vrot.lane.b32.xlu0 %v224_v21, %s1393_s3 }
  0xaf   :  { %1182 = vmatmul.msk.f32.gmra.mxu0 %vm126_vm0, %v113_v54 }
  0xb3   :  { %226 = vrot.lane.b32.xlu0 %v193_v22, %s1394_s16 }
 0x11c   :  { %v177_v20 = vpop.f32.mrf.mxu0 }
 0x11d   :  { %v232_v23 = vpop.permute.xlu0 %231 }
 0x11e   :  { %v234_v24 = vmul.f32 %v232_v23, %v224_v21 }
 0x120   :  { %236 = vrot.lane.b32.xlu1 %v234_v24, %s1394_s16 }
 0x125   :  { %v227_v25 = vpop.permute.xlu0 %226 }
 0x126   :  { %v229_v26 = vmul.f32 %v227_v25, %v224_v21 }
 0x192   :  { %v237_v27 = vpop.permute.xlu1 %236 }
 0x193   :  { %v239_v28 = vadd.f32 %v237_v27, %v229_v26 }
 0x195   :  { %1231 = vtanh.f32 %v239_v28 }
 0x19b   :  { %v1232_v29 = vpop.eup %1231 }
 0x19c   :  { %242 = vrot.lane.b32.xlu1 %v1232_v29, %s1393_s3 }
 0x20e   :  { %v243_v34 = vpop.permute.xlu1 %242 }
 0x20f   :  { %v245_v35 = vmul.f32 %v243_v34, %v224_v21  ;;  %v178_v21 = vadd.f32 %v1527_v9, %v177_v20  ;;  %v1659_v20 = vld [vmem:[#allocation3] sm:$0xff] }
 0x211   :  { %247 = vrot.lane.b32.xlu2 %v245_v35, %s1394_s16 }
 0x26b   :  { %v248_v37 = vpop.permute.xlu2 %247 }
 0x26c   :  { %1186 = vmatmul.msk.f32.vlgmr.msra.gmra.mxu2 %vm194_vm1, %v248_v37  ;;  %1193 = vmatmul.msk.f32.vlgmr.msra.gmra.mxu3 %vm194_vm1, %v248_v37 }
 0x26d   :  { %459 = vmatpush.msra.mxu2 %v1476_v0 }
 0x26f   :  { %460 = vmatpush.msra.mxu2 %v1484_v2 }
 0x271   :  { %461 = vmatpush.msra.mxu2 %v1496_v5 }
 0x273   :  { %462 = vmatpush.msra.mxu2 %v1504_v6 }
 0x2ef   :  { %v268_v40 = vpop.f32.mrf.mxu2 }
 0x2f0   :  { %v271_v41 = vadd.f32 %v268_v40, %v172_v39  ;;  %v180_v40 = vpop.f32.mrf.mxu0 }
 0x2f2   :  { %v272_v42 = vmul.f32 0.5, %v271_v41 }
 0x2f4   :  { %v273_v43 = vsel %vm1530_vm4, %v271_v41, %v272_v42  ;;  %v181_v41 = vadd.f32 %v1527_v9, %v180_v40 }
 0x2f5   :  { %1233 = vtanh.f32 %v273_v43 }
 0x2fb   :  { %v1234_v44 = vpop.eup %1233 }
 0x2fc   :  { %v275_v45 = vmul.f32 0.5, %v1234_v44 }
 0x2fe   :  { %v276_v46 = vadd.f32 0.5, %v275_v45 }
 0x300   :  { %v277_v47 = vsel %vm1530_vm4, %v1234_v44, %v276_v46 }
 0x301   :  { %280 = vrot.lane.b32.xlu2 %v277_v47, %s1393_s3  ;;  %v278_v50 = vmul.f32 %v277_v47, %v239_v28 }
 0x35b   :  { %v281_v48 = vpop.permute.xlu2 %280 }
 0x35c   :  { %v283_v49 = vmul.f32 %v281_v48, %v277_v47 }
 0x35e   :  { %285 = vrot.lane.b32.xlu0 %v283_v49, %s1394_s16 }
 0x3d0   :  { %v286_v51 = vpop.permute.xlu0 %285 }
 0x3d1   :  { %v288_v52 = vadd.f32 %v286_v51, %v278_v50 }
 0x3d3   :  { %1235 = vtanh.f32 %v288_v52 }
 0x3d9   :  { %v1236_v53 = vpop.eup %1235 }
 0x3da   :  { %291 = vrot.lane.b32.xlu1 %v1236_v53, %s1393_s3 }
 0x44c   :  { %v292_v55 = vpop.permute.xlu1 %291 }
 0x44d   :  { %v294_v56 = vmul.f32 %v292_v55, %v277_v47 }
 0x44f   :  { %296 = vrot.lane.b32.xlu2 %v294_v56, %s1394_s16  ;;  %v183_v56 = vpop.f32.mrf.mxu0 }
 0x4a9   :  { %v297_v57 = vpop.permute.xlu2 %296 }
 0x4aa   :  { %1187 = vmatmul.msk.f32.vlgmr.msrb.gmra.mxu1 %vm194_vm1, %v297_v57  ;;  %1194 = vmatmul.msk.f32.gmra.mxu3 %vm194_vm1, %v297_v57  ;;  %v184_v57 = vadd.f32 %v1527_v9, %v183_v56 }
 0x4ab   :  { %508 = vmatpush.msrb.mxu1 %v1476_v0 }
 0x4ad   :  { %509 = vmatpush.msrb.mxu1 %v1484_v2 }
 0x4af   :  { %510 = vmatpush.msrb.mxu1 %v1496_v5 }
 0x4b1   :  { %511 = vmatpush.msrb.mxu1 %v1504_v6 }
 0x527   :  { %v317_v60 = vpop.f32.mrf.mxu1 }
 0x528   :  { %v320_v61 = vadd.f32 %v317_v60, %v175_v59 }
 0x52a   :  { %v321_v62 = vmul.f32 0.5, %v320_v61 }
 0x52c   :  { %v322_v63 = vsel %vm1530_vm4, %v320_v61, %v321_v62 }
 0x52d   :  { %1237 = vtanh.f32 %v322_v63 }
 0x533   :  { %v1238_v1 = vpop.eup %1237 }
 0x534   :  { %v324_v3 = vmul.f32 0.5, %v1238_v1 }
 0x536   :  { %v325_v4 = vadd.f32 0.5, %v324_v3 }
 0x538   :  { %v326_v7 = vsel %vm1530_vm4, %v1238_v1, %v325_v4 }
 0x539   :  { %329 = vrot.lane.b32.xlu0 %v326_v7, %s1393_s3  ;;  %v327_v11 = vmul.f32 %v326_v7, %v288_v52 }
 0x5ab   :  { %v330_v8 = vpop.permute.xlu0 %329 }
 0x5ac   :  { %v332_v10 = vmul.f32 %v330_v8, %v326_v7 }
 0x5ae   :  { %334 = vrot.lane.b32.xlu1 %v332_v10, %s1394_s16 }
 0x620   :  { %v335_v12 = vpop.permute.xlu1 %334 }
 0x621   :  { %v337_v13 = vadd.f32 %v335_v12, %v327_v11 }
 0x623   :  { %1239 = vtanh.f32 %v337_v13 }
 0x629   :  { %v1240_v14 = vpop.eup %1239 }
 0x62a   :  { %340 = vrot.lane.b32.xlu2 %v1240_v14, %s1393_s3 }
 0x684   :  { %v341_v17 = vpop.permute.xlu2 %340 }
 0x685   :  { %v343_v18 = vmul.f32 %v341_v17, %v326_v7  ;;  %v1649_v17 = vld [vmem:[#allocation3 + $0x18] sm:$0xff] }
 0x687   :  { %345 = vrot.lane.b32.xlu0 %v343_v18, %s1394_s16  ;;  %v1651_v18 = vld [vmem:[#allocation3 + $0x10] sm:$0xff] }
 0x6f9   :  { %v346_v19 = vpop.permute.xlu0 %345 }
 0x6fa   :  { %1188 = vmatmul.msk.f32.vlgmr.msra.gmra.mxu1 %vm194_vm1, %v346_v19  ;;  %1195 = vmatmul.msk.f32.gmra.mxu3 %vm194_vm1, %v346_v19  ;;  %v1655_v19 = vld [vmem:[#allocation3 + $0x8] sm:$0xff] }
 0x6fb   :  { %666 = vmatpush.msra.mxu1 %v1649_v17 }
 0x6fd   :  { %667 = vmatpush.msra.mxu1 %v1651_v18 }
 0x6ff   :  { %668 = vmatpush.msra.mxu1 %v1655_v19 }
 0x701   :  { %669 = vmatpush.msra.mxu1 %v1659_v20 }
 0x777   :  { %v366_v22 = vpop.f32.mrf.mxu1 }
 0x778   :  { %v369_v23 = vadd.f32 %v366_v22, %v178_v21  ;;  %v648_v22 = vld [vmem:[#allocation6 + $0x8] sm:$0xff] }
 0x77a   :  { %v370_v24 = vmul.f32 0.5, %v369_v23 }
 0x77c   :  { %v371_v25 = vsel %vm1530_vm4, %v369_v23, %v370_v24 }
 0x77d   :  { %1241 = vtanh.f32 %v371_v25 }
 0x783   :  { %v1242_v26 = vpop.eup %1241 }
 0x784   :  { %v373_v27 = vmul.f32 0.5, %v1242_v26 }
 0x786   :  { %v374_v28 = vadd.f32 0.5, %v373_v27  ;;  %v1680_v27 = vld [vmem:[%s1864_s6] ss:$0 sm:$0xff] }
 0x788   :  { %v375_v29 = vsel %vm1530_vm4, %v1242_v26, %v374_v28 }
 0x789   :  { %378 = vrot.lane.b32.xlu1 %v375_v29, %s1393_s3  ;;  %v376_v32 = vmul.f32 %v375_v29, %v337_v13  ;;  %v114_v13 = vld [vmem:[%s1858_s0 + $0x30] sm:$0xff] }
 0x78a   :  { %1183 = vmatmul.msk.f32.gmra.mxu0 %vm126_vm0, %v114_v13 }
 0x7fb   :  { %v379_v30 = vpop.permute.xlu1 %378 }
 0x7fc   :  { %v381_v31 = vmul.f32 %v379_v30, %v375_v29 }
 0x7fe   :  { %383 = vrot.lane.b32.xlu2 %v381_v31, %s1394_s16 }
 0x807   :  { %v186_v23 = vpop.f32.mrf.mxu0 }
 0x808   :  { %v187_v24 = vadd.f32 %v1527_v9, %v186_v23 }
 0x858   :  { %v384_v33 = vpop.permute.xlu2 %383 }
 0x859   :  { %v386_v34 = vadd.f32 %v384_v33, %v376_v32 }
 0x85b   :  { %1243 = vtanh.f32 %v386_v34 }
 0x861   :  { %v1244_v35 = vpop.eup %1243 }
 0x862   :  { %389 = vrot.lane.b32.xlu0 %v1244_v35, %s1393_s3 }
 0x8d4   :  { %v390_v36 = vpop.permute.xlu0 %389 }
 0x8d5   :  { %v392_v37 = vmul.f32 %v390_v36, %v375_v29  ;;  %v623_v29 = vpop.f32.mrf.mxu3 }
 0x8d6   :  { %v624_v31 = vadd.f32 %v1680_v27, %v623_v29 }
 0x8d7   :  { %394 = vrot.lane.b32.xlu1 %v392_v37, %s1394_s16 }
 0x949   :  { %v395_v39 = vpop.permute.xlu1 %394 }
 0x94a   :  { %1189 = vmatmul.msk.f32.vlgmr.msrb.gmra.mxu2 %vm194_vm1, %v395_v39  ;;  %1196 = vmatmul.msk.f32.gmra.mxu3 %vm194_vm1, %v395_v39 }
 0x94b   :  { %557 = vmatpush.msrb.mxu2 %v1476_v0 }
 0x94d   :  { %558 = vmatpush.msrb.mxu2 %v1484_v2 }
 0x94f   :  { %559 = vmatpush.msrb.mxu2 %v1496_v5 }
 0x951   :  { %560 = vmatpush.msrb.mxu2 %v1504_v6 }
 0x9cd   :  { %v415_v42 = vpop.f32.mrf.mxu2 }
 0x9ce   :  { %v418_v43 = vadd.f32 %v415_v42, %v181_v41 }
 0x9d0   :  { %v419_v44 = vmul.f32 0.5, %v418_v43 }
 0x9d2   :  { %v420_v45 = vsel %vm1530_vm4, %v418_v43, %v419_v44  ;;  %v650_v43 = vld [vmem:[#allocation8 + $0x8] sm:$0xff] }
 0x9d3   :  { %1245 = vtanh.f32 %v420_v45 }
 0x9d9   :  { %v1246_v46 = vpop.eup %1245 }
 0x9da   :  { %v422_v47 = vmul.f32 0.5, %v1246_v46 }
 0x9dc   :  { %v423_v48 = vadd.f32 0.5, %v422_v47 }
 0x9de   :  { %v424_v0 = vsel %vm1530_vm4, %v1246_v46, %v423_v48 }
 0x9df   :  { %427 = vrot.lane.b32.xlu2 %v424_v0, %s1393_s3  ;;  %v425_v6 = vmul.f32 %v424_v0, %v386_v34 }
 0xa39   :  { %v428_v2 = vpop.permute.xlu2 %427 }
 0xa3a   :  { %v430_v5 = vmul.f32 %v428_v2, %v424_v0 }
 0xa3c   :  { %432 = vrot.lane.b32.xlu0 %v430_v5, %s1394_s16 }
 0xaae   :  { %v433_v49 = vpop.permute.xlu0 %432 }
 0xaaf   :  { %v435_v50 = vadd.f32 %v433_v49, %v425_v6 }
 0xab1   :  { %1247 = vtanh.f32 %v435_v50 }
 0xab7   :  { %v1248_v51 = vpop.eup %1247 }
 0xab8   :  { %438 = vrot.lane.b32.xlu1 %v1248_v51, %s1393_s3 }
 0xb2a   :  { %v439_v52 = vpop.permute.xlu1 %438 }
 0xb2b   :  { %v441_v53 = vmul.f32 %v439_v52, %v424_v0 }
 0xb2d   :  { %443 = vrot.lane.b32.xlu2 %v441_v53, %s1394_s16 }
 0xb87   :  { %v444_v55 = vpop.permute.xlu2 %443 }
 0xb88   :  { %1190 = vmatmul.msk.f32.vlgmr.msra.gmra.mxu2 %vm194_vm1, %v444_v55  ;;  %1197 = vmatmul.msk.f32.gmra.mxu3 %vm194_vm1, %v444_v55 }
 0xb89   :  { %736 = vmatpush.msra.mxu2 %v1649_v17 }
 0xb8b   :  { %737 = vmatpush.msra.mxu2 %v1651_v18 }
 0xb8d   :  { %738 = vmatpush.msra.mxu2 %v1655_v19 }
 0xb8f   :  { %739 = vmatpush.msra.mxu2 %v1659_v20 }
 0xc0b   :  { %v464_v58 = vpop.f32.mrf.mxu2 }
 0xc0c   :  { %v467_v59 = vadd.f32 %v464_v58, %v184_v57  ;;  %v115_v58 = vld [vmem:[%s1858_s0 + $0x38] sm:$0xff] }
 0xc0d   :  { %1184 = vmatmul.msk.f32.gmra.mxu0 %vm126_vm0, %v115_v58 }
 0xc0e   :  { %v468_v60 = vmul.f32 0.5, %v467_v59 }
 0xc10   :  { %v469_v61 = vsel %vm1530_vm4, %v467_v59, %v468_v60 }
 0xc11   :  { %1249 = vtanh.f32 %v469_v61 }
 0xc17   :  { %v1250_v62 = vpop.eup %1249 }
 0xc18   :  { %v471_v63 = vmul.f32 0.5, %v1250_v62 }
 0xc1a   :  { %v472_v1 = vadd.f32 0.5, %v471_v63 }
 0xc1c   :  { %v473_v3 = vsel %vm1530_vm4, %v1250_v62, %v472_v1  ;;  %v626_v62 = vpop.f32.mrf.mxu3 }
 0xc1d   :  { %476 = vrot.lane.b32.xlu0 %v473_v3, %s1393_s3  ;;  %v474_v8 = vmul.f32 %v473_v3, %v435_v50  ;;  %v627_v63 = vadd.f32 %v1680_v27, %v626_v62 }
 0xc8f   :  { %v477_v4 = vpop.permute.xlu0 %476 }
 0xc90   :  { %v479_v7 = vmul.f32 %v477_v4, %v473_v3 }
 0xc92   :  { %481 = vrot.lane.b32.xlu1 %v479_v7, %s1394_s16 }
 0xd04   :  { %v482_v10 = vpop.permute.xlu1 %481 }
 0xd05   :  { %v1640_v11 = vadd.f32 %v482_v10, %v474_v8 }
 0xd07   :  { %1251 = vtanh.f32 %v1640_v11 }
 0xd0d   :  { %v1252_v12 = vpop.eup %1251 }
 0xd0e   :  { %487 = vrot.lane.b32.xlu2 %v1252_v12, %s1393_s3 }
 0xd68   :  { %v488_v14 = vpop.permute.xlu2 %487 }
 0xd69   :  { %v490_v16 = vmul.f32 %v488_v14, %v473_v3 }
 0xd6b   :  { %492 = vrot.lane.b32.xlu0 %v490_v16, %s1394_s16 }
 0xddd   :  { %v493_v21 = vpop.permute.xlu0 %492 }
 0xdde   :  { %1191 = vmatmul.msk.f32.vlgmr.msrb.gmra.mxu1 %vm194_vm1, %v493_v21  ;;  %1198 = vmatmul.msk.f32.gmra.mxu3 %vm194_vm1, %v493_v21 }
 0xddf   :  { %797 = vmatpush.msrb.mxu1 %v1649_v17 }
 0xde1   :  { %798 = vmatpush.msrb.mxu1 %v1651_v18 }
 0xde3   :  { %799 = vmatpush.msrb.mxu1 %v1655_v19 }
 0xde5   :  { %800 = vmatpush.msrb.mxu1 %v1659_v20 }
 0xde6   :  { %1201 = vmatmul.msk.f32.vlgmr.msra.gmra.mxu1 %vm194_vm1, %v648_v22 }
 0xde7   :  { %919 = vmatpush.msra.mxu1 %v1649_v17 }
 0xde9   :  { %920 = vmatpush.msra.mxu1 %v1651_v18 }
 0xdeb   :  { %921 = vmatpush.msra.mxu1 %v1655_v19 }
 0xded   :  { %922 = vmatpush.msra.mxu1 %v1659_v20 }
 0xe5b   :  { %v513_v25 = vpop.f32.mrf.mxu1 }
 0xe5c   :  { %v516_v26 = vadd.f32 %v513_v25, %v187_v24 }
 0xe5e   :  { %v517_v28 = vmul.f32 0.5, %v516_v26 }
 0xe60   :  { %v518_v30 = vsel %vm1530_vm4, %v516_v26, %v517_v28  ;;  %v629_v28 = vpop.f32.mrf.mxu3 }
 0xe61   :  { %1253 = vtanh.f32 %v518_v30  ;;  %v630_v29 = vadd.f32 %v1680_v27, %v629_v28 }
 0xe63   :  { %v671_v32 = vpop.f32.mrf.mxu1 }
 0xe64   :  { %v674_v33 = vadd.f32 %v671_v32, %v624_v31 }
 0xe66   :  { %v675_v34 = vmul.f32 0.5, %v674_v33 }
 0xe67   :  { %v1254_v35 = vpop.eup %1253 }
 0xe68   :  { %v676_v36 = vsel %vm1530_vm4, %v674_v33, %v675_v34  ;;  %v520_v37 = vmul.f32 0.5, %v1254_v35 }
 0xe69   :  { %1255 = vtanh.f32 %v676_v36 }
 0xe6a   :  { %v521_v38 = vadd.f32 0.5, %v520_v37 }
 0xe6c   :  { %v522_v39 = vsel %vm1530_vm4, %v1254_v35, %v521_v38 }
 0xe6d   :  { %525 = vrot.lane.b32.xlu1 %v522_v39, %s1393_s3  ;;  %v523_v50 = vmul.f32 %v522_v39, %v1640_v11 }
 0xe6f   :  { %v1256_v40 = vpop.eup %1255 }
 0xe70   :  { %v678_v41 = vmul.f32 0.5, %v1256_v40 }
 0xe72   :  { %v679_v42 = vadd.f32 0.5, %v678_v41 }
 0xe74   :  { %v680_v44 = vsel %vm1530_vm4, %v1256_v40, %v679_v42 }
 0xe75   :  { %687 = vrot.lane.b32.xlu2 %v680_v44, %s1393_s3  ;;  %682 = vrot.lane.b32.xlu1 %v650_v43, %s1394_s16 }
 0xecf   :  { %v688_v45 = vpop.permute.xlu2 %687 }
 0xed0   :  { %v690_v46 = vmul.f32 %v688_v45, %v680_v44 }
 0xed2   :  { %692 = vrot.lane.b32.xlu2 %v690_v46, %s1394_s16 }
 0xedf   :  { %v526_v47 = vpop.permute.xlu1 %525 }
 0xee0   :  { %v528_v48 = vmul.f32 %v526_v47, %v522_v39  ;;  %v632_v47 = vpop.f32.mrf.mxu3 }
 0xee2   :  { %530 = vrot.lane.b32.xlu0 %v528_v48, %s1394_s16  ;;  %v633_v48 = vadd.f32 %v1680_v27, %v632_v47 }
 0xee7   :  { %v683_v0 = vpop.permute.xlu1 %682 }
 0xee8   :  { %v685_v2 = vmul.f32 %v683_v0, %v680_v44 }
 0xf2c   :  { %v693_v5 = vpop.permute.xlu2 %692 }
 0xf2d   :  { %v695_v6 = vadd.f32 %v693_v5, %v685_v2 }
 0xf2f   :  { %1257 = vtanh.f32 %v695_v6 }
 0xf35   :  { %v1258_v49 = vpop.eup %1257 }
 0xf36   :  { %698 = vrot.lane.b32.xlu1 %v1258_v49, %s1393_s3 }
 0xf54   :  { %v531_v51 = vpop.permute.xlu0 %530 }
 0xf55   :  { %v1698_v52 = vadd.f32 %v531_v51, %v523_v50 }
 0xf57   :  { %1259 = vtanh.f32 %v1698_v52 }
 0xf5d   :  { %v1260_v53 = vpop.eup %1259 }
 0xf5e   :  { %536 = vrot.lane.b32.xlu0 %v1260_v53, %s1393_s3 }
 0xfa8   :  { %v699_v54 = vpop.permute.xlu1 %698 }
 0xfa9   :  { %v1702_v55 = vmul.f32 %v699_v54, %v680_v44 }
 0xfab   :  { %720 = vrot.lane.b32.xlu0 %v1702_v55, %s1394_s16 }
 0xfd0   :  { %v537_v56 = vpop.permute.xlu0 %536 }
 0xfd1   :  { %v539_v57 = vmul.f32 %v537_v56, %v522_v39 }
 0xfd3   :  { %541 = vrot.lane.b32.xlu2 %v539_v57, %s1394_s16 }
0x101d   :  { %v721_v60 = vpop.permute.xlu0 %720 }
0x102d   :  { %v542_v59 = vpop.permute.xlu2 %541 }
0x102e   :  { %1192 = vmatmul.msk.f32.vlgmr.msrb.gmra.mxu2 %vm194_vm1, %v542_v59  ;;  %1199 = vmatmul.msk.f32.gmra.mxu3 %vm194_vm1, %v542_v59 }
0x102f   :  { %858 = vmatpush.msrb.mxu2 %v1649_v17 }
0x1031   :  { %859 = vmatpush.msrb.mxu2 %v1651_v18 }
0x1033   :  { %860 = vmatpush.msrb.mxu2 %v1655_v19 }
0x1035   :  { %861 = vmatpush.msrb.mxu2 %v1659_v20 }
0x1036   :  { %1202 = vmatmul.msk.f32.vlgmr.msra.gmra.mxu2 %vm194_vm1, %v721_v60  ;;  %v635_v60 = vpop.f32.mrf.mxu3 }
0x1037   :  { %980 = vmatpush.msra.mxu2 %v1649_v17  ;;  %v636_v62 = vadd.f32 %v1680_v27, %v635_v60 }
0x1039   :  { %981 = vmatpush.msra.mxu2 %v1651_v18 }
0x103b   :  { %982 = vmatpush.msra.mxu2 %v1655_v19 }
0x103d   :  { %983 = vmatpush.msra.mxu2 %v1659_v20 }
0x103e   :  { %v638_v28 = vpop.f32.mrf.mxu3 }
0x10b1   :  { %v1722_v61 = vpop.f32.mrf.mxu2 }
0x10b9   :  { %v741_v1 = vpop.f32.mrf.mxu2 }
0x10ba   :  { %v744_v3 = vadd.f32 %v741_v1, %v627_v63 }
0x10bc   :  { %v745_v4 = vmul.f32 0.5, %v744_v3 }
0x10be   :  { %v746_v7 = vsel %vm1530_vm4, %v744_v3, %v745_v4 }
0x10bf   :  { %1261 = vtanh.f32 %v746_v7 }
0x10c5   :  { %v1262_v8 = vpop.eup %1261 }
0x10c6   :  { %v748_v10 = vmul.f32 0.5, %v1262_v8 }
0x10c8   :  { %v749_v11 = vadd.f32 0.5, %v748_v10 }
0x10ca   :  { %v750_v12 = vsel %vm1530_vm4, %v1262_v8, %v749_v11 }
0x10cb   :  { %753 = vrot.lane.b32.xlu1 %v750_v12, %s1393_s3  ;;  %v751_v16 = vmul.f32 %v750_v12, %v695_v6 }
0x113d   :  { %v754_v13 = vpop.permute.xlu1 %753 }
0x113e   :  { %v756_v14 = vmul.f32 %v754_v13, %v750_v12 }
0x1140   :  { %758 = vrot.lane.b32.xlu2 %v756_v14, %s1394_s16 }
0x119a   :  { %v759_v21 = vpop.permute.xlu2 %758 }
0x119b   :  { %v761_v22 = vadd.f32 %v759_v21, %v751_v16 }
0x119d   :  { %1263 = vtanh.f32 %v761_v22 }
0x11a3   :  { %v1264_v23 = vpop.eup %1263 }
0x11a4   :  { %764 = vrot.lane.b32.xlu0 %v1264_v23, %s1393_s3 }
0x1216   :  { %v765_v24 = vpop.permute.xlu0 %764 }
0x1217   :  { %v1732_v25 = vmul.f32 %v765_v24, %v750_v12 }
0x1219   :  { %781 = vrot.lane.b32.xlu1 %v1732_v25, %s1394_s16 }
0x128b   :  { %v782_v26 = vpop.permute.xlu1 %781 }
0x128c   :  { %1204 = vmatmul.msk.f32.vlgmr.msrb.gmra.mxu1 %vm194_vm1, %v782_v26 }
0x128d   :  { %1041 = vmatpush.msrb.mxu1 %v1649_v17 }
0x128f   :  { %1042 = vmatpush.msrb.mxu1 %v1651_v18 }
0x1291   :  { %1043 = vmatpush.msrb.mxu1 %v1655_v19 }
0x1293   :  { %1044 = vmatpush.msrb.mxu1 %v1659_v20 }
0x1309   :  { %v802_v30 = vpop.f32.mrf.mxu1 }
0x130a   :  { %v805_v31 = vadd.f32 %v802_v30, %v630_v29  ;;  %v639_v29 = vadd.f32 %v1680_v27, %v638_v28 }
0x130c   :  { %v806_v32 = vmul.f32 0.5, %v805_v31 }
0x130e   :  { %v807_v33 = vsel %vm1530_vm4, %v805_v31, %v806_v32 }
0x130f   :  { %1265 = vtanh.f32 %v807_v33 }
0x1315   :  { %v1266_v34 = vpop.eup %1265 }
0x1316   :  { %v809_v35 = vmul.f32 0.5, %v1266_v34 }
0x1318   :  { %v810_v36 = vadd.f32 0.5, %v809_v35 }
0x131a   :  { %v811_v37 = vsel %vm1530_vm4, %v1266_v34, %v810_v36 }
0x131b   :  { %814 = vrot.lane.b32.xlu2 %v811_v37, %s1393_s3  ;;  %v812_v40 = vmul.f32 %v811_v37, %v761_v22 }
0x1375   :  { %v815_v38 = vpop.permute.xlu2 %814 }
0x1376   :  { %v817_v39 = vmul.f32 %v815_v38, %v811_v37  ;;  %v189_v38 = vpop.f32.mrf.mxu0 }
0x1378   :  { %819 = vrot.lane.b32.xlu0 %v817_v39, %s1394_s16  ;;  %v190_v39 = vadd.f32 %v1527_v9, %v189_v38 }
0x13ea   :  { %v820_v41 = vpop.permute.xlu0 %819 }
0x13eb   :  { %v822_v42 = vadd.f32 %v820_v41, %v812_v40  ;;  %v565_v40 = vadd.f32 %v1722_v61, %v190_v39 }
0x13ed   :  { %1267 = vtanh.f32 %v822_v42  ;;  %v566_v41 = vmul.f32 0.5, %v565_v40 }
0x13f3   :  { %v1268_v43 = vpop.eup %1267 }
0x13f4   :  { %825 = vrot.lane.b32.xlu1 %v1268_v43, %s1393_s3 }
0x1466   :  { %v826_v44 = vpop.permute.xlu1 %825 }
0x1467   :  { %v1749_v45 = vmul.f32 %v826_v44, %v811_v37 }
0x1469   :  { %842 = vrot.lane.b32.xlu2 %v1749_v45, %s1394_s16 }
0x14c3   :  { %v843_v46 = vpop.permute.xlu2 %842 }
0x14c4   :  { %1206 = vmatmul.msk.f32.vlgmr.msrb.gmra.mxu2 %vm194_vm1, %v843_v46 }
0x14c5   :  { %1102 = vmatpush.msrb.mxu2 %v1649_v17 }
0x14c7   :  { %1103 = vmatpush.msrb.mxu2 %v1651_v18 }
0x14c9   :  { %1104 = vmatpush.msrb.mxu2 %v1655_v19 }
0x14cb   :  { %1105 = vmatpush.msrb.mxu2 %v1659_v20 }
0x1547   :  { %v863_v0 = vpop.f32.mrf.mxu2 }
0x1548   :  { %v866_v2 = vadd.f32 %v863_v0, %v633_v48 }
0x154a   :  { %v867_v5 = vmul.f32 0.5, %v866_v2 }
0x154c   :  { %v868_v6 = vsel %vm1530_vm4, %v866_v2, %v867_v5 }
0x154d   :  { %1269 = vtanh.f32 %v868_v6 }
0x1553   :  { %v1270_v49 = vpop.eup %1269 }
0x1554   :  { %v870_v50 = vmul.f32 0.5, %v1270_v49 }
0x1556   :  { %v871_v51 = vadd.f32 0.5, %v870_v50 }
0x1558   :  { %v872_v17 = vsel %vm1530_vm4, %v1270_v49, %v871_v51 }
0x1559   :  { %875 = vrot.lane.b32.xlu0 %v872_v17, %s1393_s3  ;;  %v873_v20 = vmul.f32 %v872_v17, %v822_v42  ;;  %v567_v42 = vsel %vm1530_vm4, %v565_v40, %v566_v41 }
0x15cb   :  { %v876_v18 = vpop.permute.xlu0 %875 }
0x15cc   :  { %v878_v19 = vmul.f32 %v876_v18, %v872_v17  ;;  %v641_v18 = vpop.f32.mrf.mxu3 }
0x15ce   :  { %880 = vrot.lane.b32.xlu1 %v878_v19, %s1394_s16  ;;  %v642_v19 = vadd.f32 %v1680_v27, %v641_v18 }
0x1640   :  { %v881_v53 = vpop.permute.xlu1 %880 }
0x1641   :  { %v883_v54 = vadd.f32 %v881_v53, %v873_v20 }
0x1643   :  { %1271 = vtanh.f32 %v883_v54 }
0x1649   :  { %v1272_v56 = vpop.eup %1271 }
0x164a   :  { %886 = vrot.lane.b32.xlu2 %v1272_v56, %s1393_s3 }
0x16a4   :  { %v887_v57 = vpop.permute.xlu2 %886 }
0x16a5   :  { %v1766_v58 = vmul.f32 %v887_v57, %v872_v17 }
0x16a7   :  { %903 = vrot.lane.b32.xlu0 %v1766_v58, %s1394_s16 }
0x1719   :  { %v904_v59 = vpop.permute.xlu0 %903 }
0x171a   :  { %1208 = vmatmul.msk.f32.vlgmr.msra.gmra.mxu1 %vm194_vm1, %v904_v59 }
0x1797   :  { %v924_v63 = vpop.f32.mrf.mxu1 }
0x1798   :  { %v927_v1 = vadd.f32 %v924_v63, %v636_v62 }
0x179a   :  { %v928_v3 = vmul.f32 0.5, %v927_v1 }
0x179c   :  { %v929_v4 = vsel %vm1530_vm4, %v927_v1, %v928_v3 }
0x179d   :  { %1273 = vtanh.f32 %v929_v4 }
0x17a3   :  { %v1274_v7 = vpop.eup %1273 }
0x17a4   :  { %v931_v8 = vmul.f32 0.5, %v1274_v7 }
0x17a6   :  { %v932_v10 = vadd.f32 0.5, %v931_v8 }
0x17a8   :  { %v933_v11 = vsel %vm1530_vm4, %v1274_v7, %v932_v10 }
0x17a9   :  { %936 = vrot.lane.b32.xlu1 %v933_v11, %s1393_s3  ;;  %v934_v14 = vmul.f32 %v933_v11, %v883_v54 }
0x181b   :  { %v937_v12 = vpop.permute.xlu1 %936 }
0x181c   :  { %v939_v13 = vmul.f32 %v937_v12, %v933_v11 }
0x181e   :  { %941 = vrot.lane.b32.xlu2 %v939_v13, %s1394_s16 }
0x1878   :  { %v942_v16 = vpop.permute.xlu2 %941 }
0x1879   :  { %v944_v21 = vadd.f32 %v942_v16, %v934_v14 }
0x187b   :  { %1275 = vtanh.f32 %v944_v21 }
0x1881   :  { %v1276_v22 = vpop.eup %1275 }
0x1882   :  { %947 = vrot.lane.b32.xlu0 %v1276_v22, %s1393_s3 }
0x18f4   :  { %v948_v23 = vpop.permute.xlu0 %947 }
0x18f5   :  { %v1779_v24 = vmul.f32 %v948_v23, %v933_v11  ;;  %v1228_v23 = vld [vmem:[%s1867_s9] ss:$0 sm:$0xff]  ;;  %s1203_s9 = sld [smem:[#allocation9 + $0x1]] }
0x18f7   :  { %964 = vrot.lane.b32.xlu1 %v1779_v24, %s1394_s16 }
0x1969   :  { %v965_v26 = vpop.permute.xlu1 %964 }
0x196a   :  { %1210 = vmatmul.msk.f32.vlgmr.msra.gmra.mxu2 %vm194_vm1, %v965_v26 }
0x19ed   :  { %v985_v30 = vpop.f32.mrf.mxu2 }
0x19ee   :  { %v988_v31 = vadd.f32 %v985_v30, %v639_v29 }
0x19f0   :  { %v989_v32 = vmul.f32 0.5, %v988_v31 }
0x19f2   :  { %v990_v33 = vsel %vm1530_vm4, %v988_v31, %v989_v32 }
0x19f3   :  { %1277 = vtanh.f32 %v990_v33 }
0x19f4   :  { %1279 = vtanh.f32 %v567_v42 }
0x19f9   :  { %v1278_v34 = vpop.eup %1277 }
0x19fa   :  { %v992_v35 = vmul.f32 0.5, %v1278_v34  ;;  %v1280_v43 = vpop.eup %1279 }
0x19fb   :  { %v569_v47 = vmul.f32 0.5, %v1280_v43 }
0x19fc   :  { %v993_v36 = vadd.f32 0.5, %v992_v35 }
0x19fd   :  { %v570_v48 = vadd.f32 0.5, %v569_v47 }
0x19fe   :  { %v994_v37 = vsel %vm1530_vm4, %v1278_v34, %v993_v36 }
0x19ff   :  { %997 = vrot.lane.b32.xlu2 %v994_v37, %s1393_s3  ;;  %v571_v0 = vsel %vm1530_vm4, %v1280_v43, %v570_v48  ;;  %v995_v9 = vmul.f32 %v994_v37, %v944_v21 }
0x1a00   :  { %v572_v60 = vmul.f32 %v571_v0, %v1698_v52 }
0x1a59   :  { %v998_v44 = vpop.permute.xlu2 %997 }
0x1a5a   :  { %v1000_v46 = vmul.f32 %v998_v44, %v994_v37 }
0x1a5c   :  { %1002 = vrot.lane.b32.xlu0 %v1000_v46, %s1394_s16 }
0x1a64   :  { %574 = vrot.lane.b32.xlu0 %v571_v0, %s1393_s3 }
0x1ace   :  { %v1003_v2 = vpop.permute.xlu0 %1002 }
0x1acf   :  { %v1005_v61 = vadd.f32 %v1003_v2, %v995_v9 }
0x1ad1   :  { %1281 = vtanh.f32 %v1005_v61 }
0x1ad6   :  { %v575_v50 = vpop.permute.xlu0 %574 }
0x1ad7   :  { %v1282_v5 = vpop.eup %1281  ;;  %v577_v51 = vmul.f32 %v575_v50, %v571_v0 }
0x1ad8   :  { %1008 = vrot.lane.b32.xlu1 %v1282_v5, %s1393_s3 }
0x1b4a   :  { %v1009_v6 = vpop.permute.xlu1 %1008 }
0x1b4b   :  { %v1799_v49 = vmul.f32 %v1009_v6, %v994_v37 }
0x1b4d   :  { %1025 = vrot.lane.b32.xlu2 %v1799_v49, %s1394_s16 }
0x1b55   :  { %579 = vrot.lane.b32.xlu2 %v577_v51, %s1394_s16 }
0x1ba7   :  { %v1026_v17 = vpop.permute.xlu2 %1025 }
0x1ba8   :  { %1212 = vmatmul.msk.f32.vlgmr.msrb.gmra.mxu1 %vm194_vm1, %v1026_v17 }
0x1baf   :  { %v580_v59 = vpop.permute.xlu2 %579 }
0x1bb0   :  { %v582_v63 = vadd.f32 %v580_v59, %v572_v60 }
0x1c25   :  { %v1046_v20 = vpop.f32.mrf.mxu1 }
0x1c26   :  { %v1049_v53 = vadd.f32 %v1046_v20, %v642_v19 }
0x1c28   :  { %v1050_v54 = vmul.f32 0.5, %v1049_v53 }
0x1c2a   :  { %v1051_v56 = vsel %vm1530_vm4, %v1049_v53, %v1050_v54 }
0x1c2b   :  { %1283 = vtanh.f32 %v1051_v56 }
0x1c2c   :  { %1285 = vtanh.f32 %v582_v63 }
0x1c31   :  { %v1284_v57 = vpop.eup %1283 }
0x1c32   :  { %v1053_v62 = vmul.f32 0.5, %v1284_v57  ;;  %v1286_v4 = vpop.eup %1285 }
0x1c34   :  { %v1054_v1 = vadd.f32 0.5, %v1053_v62  ;;  %v777_v62 = vstv %s1203_s9 }
0x1c36   :  { %v1055_v3 = vsel %vm1530_vm4, %v1284_v57, %v1054_v1 }
0x1c37   :  { %1058 = vrot.lane.b32.xlu1 %v1055_v3, %s1393_s3  ;;  %v1056_v52 = vmul.f32 %v1055_v3, %v1005_v61 }
0x1c3f   :  { %585 = vrot.lane.b32.xlu1 %v1286_v4, %s1393_s3 }
0x1ca9   :  { %v1059_v7 = vpop.permute.xlu1 %1058 }
0x1caa   :  { %v1061_v8 = vmul.f32 %v1059_v7, %v1055_v3  ;;  %v838_v7 = vstv %s1205_s7 }
0x1cac   :  { %1063 = vrot.lane.b32.xlu0 %v1061_v8, %s1394_s16 }
0x1cb1   :  { %v586_v10 = vpop.permute.xlu1 %585 }
0x1cb2   :  { %v588_v11 = vmul.f32 %v586_v10, %v571_v0  ;;  %v899_v10 = vstv %s1207_s18 }
0x1cb4   :  { %602 = vrot.lane.b32.xlu0 %v588_v11, %s1394_s16 }
0x1d1e   :  { %v1064_v12 = vpop.permute.xlu0 %1063 }
0x1d1f   :  { %v1066_v13 = vadd.f32 %v1064_v12, %v1056_v52  ;;  %v960_v52 = vstv %s1209_s19 }
0x1d21   :  { %1287 = vtanh.f32 %v1066_v13 }
0x1d26   :  { %v603_v14 = vpop.permute.xlu0 %602 }
0x1d27   :  { %v1288_v16 = vpop.eup %1287  ;;  %1200 = vmatmul.msk.f32.gmra.mxu3 %vm194_vm1, %v603_v14  ;;  %v1021_v14 = vstv %s1211_s20 }
0x1d28   :  { %1069 = vrot.lane.b32.xlu2 %v1288_v16, %s1393_s3 }
0x1d82   :  { %v1070_v21 = vpop.permute.xlu2 %1069 }
0x1d83   :  { %v1072_v22 = vmul.f32 %v1070_v21, %v1055_v3 }
0x1d85   :  { %1086 = vrot.lane.b32.xlu1 %v1072_v22, %s1394_s16 }
0x1d8d   :  { %704 = vrot.lane.b32.xlu1 %v1228_v23, %s1395_s17 }
0x1daa   :  { %v644_v28 = vpop.f32.mrf.mxu3 }
0x1dab   :  { %v645_v29 = vadd.f32 %v1680_v27, %v644_v28 }
0x1df7   :  { %v1087_v26 = vpop.permute.xlu1 %1086 }
0x1df8   :  { %1214 = vmatmul.msk.f32.vlgmr.msrb.gmra.mxu2 %vm194_vm1, %v1087_v26 }
0x1dff   :  { %v705_v38 = vpop.permute.xlu1 %704 }
0x1e00   :  { %v707_v39 = vmul.f32 %v705_v38, %v1702_v55  ;;  %v768_v27 = vmul.f32 %v1732_v25, %v705_v38  ;;  %v829_v40 = vmul.f32 %v1749_v45, %v705_v38  ;;  %v890_v41 = vmul.f32 %v1766_v58, %v705_v38 }
0x1e01   :  { %v951_v15 = vmul.f32 %v1779_v24, %v705_v38  ;;  %v1012_v55 = vmul.f32 %v1799_v49, %v705_v38  ;;  %v1073_v42 = vmul.f32 %v1072_v22, %v705_v38 }
0x1e7b   :  { %v1107_v30 = vpop.f32.mrf.mxu2 }
0x1e7c   :  { %v1110_v31 = vadd.f32 %v1107_v30, %v645_v29 }
0x1e7e   :  { %v1111_v32 = vmul.f32 0.5, %v1110_v31 }
0x1e80   :  { %v1112_v33 = vsel %vm1530_vm4, %v1110_v31, %v1111_v32  ;;  %v1143_v32 = vstv %s1215_s21 }
0x1e81   :  { %1289 = vtanh.f32 %v1112_v33 }
0x1e87   :  { %v1290_v34 = vpop.eup %1289 }
0x1e88   :  { %v1114_v35 = vmul.f32 0.5, %v1290_v34 }
0x1e8a   :  { %v1115_v36 = vadd.f32 0.5, %v1114_v35 }
0x1e8c   :  { %v1116_v37 = vsel %vm1530_vm4, %v1290_v34, %v1115_v36 }
0x1e8d   :  { %1119 = vrot.lane.b32.xlu2 %v1116_v37, %s1393_s3  ;;  %v1117_v47 = vmul.f32 %v1116_v37, %v1066_v13 }
0x1e95   :  { %709 = vrot.lane.b32.xlu2 %v707_v39, %s1394_s16 }
0x1e9d   :  { %770 = vrot.lane.b32.xlu2 %v768_v27, %s1394_s16 }
0x1ea5   :  { %831 = vrot.lane.b32.xlu2 %v829_v40, %s1394_s16 }
0x1ead   :  { %892 = vrot.lane.b32.xlu2 %v890_v41, %s1394_s16 }
0x1eb5   :  { %953 = vrot.lane.b32.xlu2 %v951_v15, %s1394_s16 }
0x1ebd   :  { %1014 = vrot.lane.b32.xlu2 %v1012_v55, %s1394_s16 }
0x1ec5   :  { %1075 = vrot.lane.b32.xlu2 %v1073_v42, %s1394_s16 }
0x1ee7   :  { %v1120_v25 = vpop.permute.xlu2 %1119 }
0x1ee8   :  { %v1122_v43 = vmul.f32 %v1120_v25, %v1116_v37 }
0x1eea   :  { %1124 = vrot.lane.b32.xlu0 %v1122_v43, %s1394_s16 }
0x1eef   :  { %v710_v45 = vpop.permute.xlu2 %709 }
0x1ef0   :  { %v712_v24 = vsel %vm194_vm1, %v710_v45, 0.0 }
0x1ef7   :  { %v771_v44 = vpop.permute.xlu2 %770 }
0x1ef8   :  { %v773_v61 = vsel %vm194_vm1, %v771_v44, 0.0 }
0x1eff   :  { %v832_v58 = vpop.permute.xlu2 %831 }
0x1f00   :  { %v834_v46 = vsel %vm194_vm1, %v832_v58, 0.0 }
0x1f01   :  { %835 = vadd.xlane.f32.xlu2 %v834_v46 }
0x1f07   :  { %v893_v2 = vpop.permute.xlu2 %892 }
0x1f08   :  { %v895_v6 = vsel %vm194_vm1, %v893_v2, 0.0 }
0x1f0f   :  { %v954_v5 = vpop.permute.xlu2 %953 }
0x1f10   :  { %v956_v50 = vsel %vm194_vm1, %v954_v5, 0.0 }
0x1f14   :  { %713 = vadd.xlane.f32.xlu0 %v712_v24 }
0x1f17   :  { %v1015_v49 = vpop.permute.xlu2 %1014 }
0x1f18   :  { %v1017_v53 = vsel %vm194_vm1, %v1015_v49, 0.0 }
0x1f1f   :  { %v1076_v51 = vpop.permute.xlu2 %1075 }
0x1f20   :  { %v1078_v17 = vsel %vm194_vm1, %v1076_v51, 0.0 }
0x1f5c   :  { %v1125_v48 = vpop.permute.xlu0 %1124 }
0x1f5d   :  { %v1127_v0 = vadd.f32 %v1125_v48, %v1117_v47 }
0x1f5f   :  { %1291 = vtanh.f32 %v1127_v0 }
0x1f65   :  { %v1292_v9 = vpop.eup %1291 }
0x1f66   :  { %1130 = vrot.lane.b32.xlu1 %v1292_v9, %s1393_s3  ;;  %s715_s3 = sld [smem:[#allocation9]] }
0x1f6c   :  { %v716_v63 = vstv %s715_s3 }
0x1f74   :  { %v836_v8 = vpop.xlane.xlu2 %835 }
0x1f75   :  { %v839_v12 = vmul.f32 %v838_v7, %v836_v8 }
0x1f87   :  { %v714_v54 = vpop.xlane.xlu0 %713 }
0x1f88   :  { %v717_v4 = vmul.f32 %v716_v63, %v714_v54 }
0x1f90   :  { %774 = vadd.xlane.f32.xlu1 %v773_v61 }
0x1f98   :  { %896 = vadd.xlane.f32.xlu1 %v895_v6 }
0x1fa0   :  { %957 = vadd.xlane.f32.xlu1 %v956_v50 }
0x1fa8   :  { %1079 = vadd.xlane.f32.xlu1 %v1078_v17 }
0x1fd8   :  { %v1131_v18 = vpop.permute.xlu1 %1130 }
0x1fd9   :  { %v1133_v19 = vmul.f32 %v1131_v18, %v1116_v37  ;;  %v1147_v37 = vstv %s1869_s11 }
0x1fdb   :  { %v1134_v20 = vmul.f32 %v1133_v19, %v705_v38 }
0x1fdd   :  { %1136 = vrot.lane.b32.xlu0 %v1134_v20, %s1394_s16  ;;  %s1213_s16 = sld [smem:[#allocation9 + $0x6]] }
0x1fe3   :  { %v1082_v30 = vstv %s1213_s16 }
0x2003   :  { %v775_v59 = vpop.xlane.xlu1 %774 }
0x2004   :  { %v778_v3 = vmul.f32 %v777_v62, %v775_v59 }
0x2006   :  { %v779_v11 = vadd.f32 %v778_v3, %v717_v4 }
0x2007   :  { %1018 = vadd.xlane.f32.xlu0 %v1017_v53 }
0x2008   :  { %v840_v21 = vadd.f32 %v839_v12, %v779_v11 }
0x200b   :  { %v897_v60 = vpop.xlane.xlu1 %896 }
0x200c   :  { %v900_v13 = vmul.f32 %v899_v10, %v897_v60 }
0x200e   :  { %v901_v26 = vadd.f32 %v900_v13, %v840_v21 }
0x2013   :  { %v958_v1 = vpop.xlane.xlu1 %957 }
0x2014   :  { %v961_v22 = vmul.f32 %v960_v52, %v958_v1 }
0x2016   :  { %v962_v29 = vadd.f32 %v961_v22, %v901_v26 }
0x201b   :  { %v1080_v23 = vpop.xlane.xlu1 %1079 }
0x201c   :  { %v1083_v33 = vmul.f32 %v1082_v30, %v1080_v23 }
0x204f   :  { %v1137_v56 = vpop.permute.xlu0 %1136 }
0x2050   :  { %v1139_v57 = vsel %vm194_vm1, %v1137_v56, 0.0 }
0x2051   :  { %1140 = vadd.xlane.f32.xlu1 %v1139_v57 }
0x207a   :  { %v1019_v16 = vpop.xlane.xlu0 %1018 }
0x207b   :  { %v1022_v28 = vmul.f32 %v1021_v14, %v1019_v16 }
0x207d   :  { %v1023_v31 = vadd.f32 %v1022_v28, %v962_v29 }
0x207f   :  { %v1084_v35 = vadd.f32 %v1083_v33, %v1023_v31 }
0x20c4   :  { %v1141_v34 = vpop.xlane.xlu1 %1140 }
0x20c5   :  { %v1144_v36 = vmul.f32 %v1143_v32, %v1141_v34 }
0x20c7   :  { %v1145_v38 = vadd.f32 %v1144_v36, %v1084_v35 }
0x20c9   :  { %v1148_v39 = vadd.f32 %v1147_v37, %v1145_v38 }
0x20cb   :  { %v1216_v27 = vmul.f32 -1.442695, %v1148_v39 }
0x20cd   :  { %1293 = vpow2.f32 %v1216_v27 }
0x20d3   :  { %v1294_v40 = vpop.eup %1293 }
0x20d4   :  { %v1152_v41 = vadd.f32 1.0, %v1294_v40 }
0x20d6   :  { %1295 = vrcp.f32 %v1152_v41  ;;  %v1164_v25 = vand.u32 2147483648, %v1152_v41  ;;  %v1162_v45 = vand.u32 2147483647, %v1152_v41  ;;  %vm1158_vm6 = vweird.f32 %v1152_v41 }
0x20d8   :  { %v1165_v58 = vor.u32 1.1754944e-38, %v1164_v25  ;;  %vm1163_vm9 = vcmp.eq.f32.partialorder %v1162_v45, 8.507059e+37 }
0x20dc   :  { %v1296_v15 = vpop.eup %1295 }
0x20dd   :  { %v1154_v55 = vmul.f32 %v1296_v15, %v1152_v41  ;;  %vm1159_vm5 = vweird.f32 %v1296_v15 }
0x20de   :  { %vm1160_vm8 = vmor %vm1158_vm6, %vm1159_vm5 }
0x20df   :  { %v1155_v42 = vsub.f32 1.0, %v1154_v55 }
0x20e1   :  { %v1156_v43 = vmul.f32 %v1296_v15, %v1155_v42 }
0x20e3   :  { %v1157_v44 = vadd.f32 %v1296_v15, %v1156_v43 }
0x20e5   :  { %v1161_v46 = vsel %vm1160_vm8, %v1296_v15, %v1157_v44 }
0x20e6   :  { %v1166_v24 = vsel %vm1163_vm9, %v1165_v58, %v1161_v46 }
0x20e7   :  { %1169 = vst.msk [vmem:[%s1870_s12] sm:$0xff] %vm1168_vm7, %v1166_v24 }
0x20e8   :  { %1174 = vsyncpa [#allocation4], 1 }
0x20e9   :  { %1175 = vsyncpa [#allocation7], 1 }
0x20ea   :  { %1176 = vsyncpa [#allocation5], 1 }

</bundles_post_ra>
